<compile_context>
chip_gen: v7x
topology: tpu7x:2x2x1
jax: 0.10.0
libtpu: 0.0.40
codegen_flags: <defaults>
</compile_context>

<pallas_src>
import jax
import jax.numpy as jnp
from jax.experimental import pallas as pl
from jax.experimental.pallas import tpu as pltpu

IN_DIM = 28 * 28          # 784
IN_PAD = 896              # 7 * 128 (K of first matmul, lane-aligned)
HIDDEN = 512
OUT_DIM = 10
OUT_PAD = 128             # lane-dense logits slab; wrapper slices [:, :10]


def mlp_kernel(x_ref, w1_ref, b1_ref, w2_ref, b2_ref, w3_ref, b3_ref, o_ref):
    # layer1 + ReLU (bf16 MXU inputs, f32 accumulation, f32 bias/activation)
    h1 = jnp.dot(x_ref[...], w1_ref[...], preferred_element_type=jnp.float32)
    h1 = jnp.maximum(h1 + b1_ref[...], 0.0)
    # layer2 + ReLU
    h2 = jnp.dot(h1.astype(jnp.bfloat16), w2_ref[...], preferred_element_type=jnp.float32)
    h2 = jnp.maximum(h2 + b2_ref[...], 0.0)
    # layer3 (logits, no activation) -- lane-dense (TB, 128) unmasked store
    o = jnp.dot(h2.astype(jnp.bfloat16), w3_ref[...], preferred_element_type=jnp.float32)
    o_ref[...] = (o + b3_ref[...]).astype(o_ref.dtype)


def prepare_params(params):
    """Pad + cast PyTorch-style (in, out) f32 params for the kernel.

    Returns bf16 weights padded to (IN_PAD,HIDDEN)/(HIDDEN,HIDDEN)/(HIDDEN,OUT_PAD)
    and f32 biases shaped (1,HIDDEN)/(1,HIDDEN)/(1,OUT_PAD). Zero padding keeps the
    math identical to the unpadded network.
    """
    w1, b1, w2, b2, w3, b3 = params
    w1p = jnp.zeros((IN_PAD, HIDDEN), jnp.bfloat16).at[:IN_DIM, :].set(w1.astype(jnp.bfloat16))
    w2p = w2.astype(jnp.bfloat16)
    w3p = jnp.zeros((HIDDEN, OUT_PAD), jnp.bfloat16).at[:, :OUT_DIM].set(w3.astype(jnp.bfloat16))
    b1p = b1.reshape(1, HIDDEN).astype(jnp.float32)
    b2p = b2.reshape(1, HIDDEN).astype(jnp.float32)
    b3p = jnp.zeros((1, OUT_PAD), jnp.float32).at[:, :OUT_DIM].set(
        b3.reshape(1, OUT_DIM).astype(jnp.float32))
    return (w1p, b1p, w2p, b2p, w3p, b3p)


def mnist_mlp_forward(x, prepared_params, *, tb=256):
    """x: (B, 1, 28, 28) or (B, 784) float32. Returns (B, 10) f32 logits.

    tb: batch tile, multiple of 128 (128 fills the v5e MXU, 256+ fills v6e/v7x).
    """
    w1, b1, w2, b2, w3, b3 = prepared_params
    x2d = x.reshape(-1, IN_DIM)  # mirrors x.reshape(-1, 28*28) in the PyTorch module
    B = x2d.shape[0]

    # Pad batch to a multiple of tb and features to IN_PAD (zeros; sliced away at the end).
    n_tiles = pl.cdiv(B, tb)
    B_pad = n_tiles * tb
    x_p = jnp.pad(x2d.astype(jnp.bfloat16),
                  ((0, B_pad - B), (0, IN_PAD - IN_DIM)))

    flops = 2 * B_pad * (IN_PAD * HIDDEN + HIDDEN * HIDDEN + HIDDEN * OUT_PAD)
    bytes_accessed = (
        x_p.size * 2                                   # bf16 activations in
        + (w1.size + w2.size + w3.size) * 2            # bf16 weights
        + (b1.size + b2.size + b3.size) * 4            # f32 biases
        + B_pad * OUT_PAD * 4                          # f32 logits out
    )

    out_padded = pl.pallas_call(
        mlp_kernel,
        out_shape=jax.ShapeDtypeStruct((B_pad, OUT_PAD), jnp.float32),
        grid_spec=pltpu.PrefetchScalarGridSpec(
            num_scalar_prefetch=0,
            grid=(n_tiles,),
            in_specs=[
                pl.BlockSpec((tb, IN_PAD), lambda i: (i, 0)),          # x: tiled over batch
                pl.BlockSpec((IN_PAD, HIDDEN), lambda i: (0, 0)),      # w1: VMEM-resident
                pl.BlockSpec((1, HIDDEN), lambda i: (0, 0)),           # b1
                pl.BlockSpec((HIDDEN, HIDDEN), lambda i: (0, 0)),      # w2
                pl.BlockSpec((1, HIDDEN), lambda i: (0, 0)),           # b2
                pl.BlockSpec((HIDDEN, OUT_PAD), lambda i: (0, 0)),     # w3 (padded to 128 cols)
                pl.BlockSpec((1, OUT_PAD), lambda i: (0, 0)),          # b3
            ],
            out_specs=pl.BlockSpec((tb, OUT_PAD), lambda i: (i, 0)),
        ),
        compiler_params=pltpu.CompilerParams(
            dimension_semantics=("parallel",),   # megacore sharding on v7x; no-op elsewhere
        ),
        cost_estimate=pl.CostEstimate(
            flops=flops, transcendentals=0, bytes_accessed=bytes_accessed),
    )(x_p, w1, b1, w2, b2, w3, b3)

    return out_padded[:B, :OUT_DIM]


def init_params(key):
    """Deterministic init, PyTorch Linear-style: W ~ U(-1/sqrt(fan_in), 1/sqrt(fan_in)).
    Weights stored (in_features, out_features) so y = x @ W + b == PyTorch's x @ W.T + b."""
    ks = jax.random.split(key, 6)

    def linear(kw, kb, fan_in, fan_out):
        bound = 1.0 / (fan_in ** 0.5)
        w = jax.random.uniform(kw, (fan_in, fan_out), jnp.float32, -bound, bound)
        b = jax.random.uniform(kb, (1, fan_out), jnp.float32, -bound, bound)
        return w, b

    w1, b1 = linear(ks[0], ks[1], IN_DIM, HIDDEN)
    w2, b2 = linear(ks[2], ks[3], HIDDEN, HIDDEN)
    w3, b3 = linear(ks[4], ks[5], HIDDEN, OUT_DIM)
    return (w1, b1, w2, b2, w3, b3)


def ref_forward(x, params):
    """Plain-JAX reference with the same bf16-in / f32-accumulate numerics as the kernel."""
    w1, b1, w2, b2, w3, b3 = params
    x2d = x.reshape(-1, IN_DIM)

    def mm(a, w):
        return jnp.dot(a.astype(jnp.bfloat16).astype(jnp.float32),
                       w.astype(jnp.bfloat16).astype(jnp.float32),
                       precision=jax.lax.Precision.HIGHEST)

    h = jnp.maximum(mm(x2d, w1) + b1, 0.0)
    h = jnp.maximum(mm(h, w2) + b2, 0.0)
    return mm(h, w3) + b3


if __name__ == "__main__":
    key = jax.random.PRNGKey(0)
    k_x, k_p = jax.random.split(key)

    B = 8  # small batch
    x = jax.random.normal(k_x, (B, 1, 28, 28), dtype=jnp.float32)  # NCHW like PyTorch MNIST
    params = init_params(k_p)
    prepared = prepare_params(params)

    out = mnist_mlp_forward(x, prepared, tb=128)
    out = jax.block_until_ready(out)

    ref = ref_forward(x, params)
    assert out.shape == (B, OUT_DIM)
    assert jnp.allclose(out, ref, atol=5e-3, rtol=5e-3), float(jnp.max(jnp.abs(out - ref)))

    print("KERNEL_OK")
</pallas_src>

<mosaic_0001>
module attributes {stable_mosaic.version = 11 : i64} {
  func.func @mlp_kernel(%arg0: i32, %arg1: memref<128x896xbf16, #tpu.memory_space<vmem>>, %arg2: memref<896x512xbf16, #tpu.memory_space<vmem>>, %arg3: memref<1x512xf32, #tpu.memory_space<vmem>>, %arg4: memref<512x512xbf16, #tpu.memory_space<vmem>>, %arg5: memref<1x512xf32, #tpu.memory_space<vmem>>, %arg6: memref<512x128xbf16, #tpu.memory_space<vmem>>, %arg7: memref<1x128xf32, #tpu.memory_space<vmem>>, %arg8: memref<128x128xf32, #tpu.memory_space<vmem>>) attributes {dimension_semantics = [#tpu.dimension_semantics<parallel>], iteration_bounds = array<i64: 1>, scalar_prefetch = 0 : i64, scratch_operands = 0 : i64, tpu.core_type = #tpu.core_type<tc>, window_params = [{transform_indices = @transform_0, window_bounds = array<i64: 128, 896>}, {pipeline_mode = #tpu.pipeline_mode<synchronous>, transform_indices = @transform_1, window_bounds = array<i64: 896, 512>}, {pipeline_mode = #tpu.pipeline_mode<synchronous>, transform_indices = @transform_2, window_bounds = array<i64: 1, 512>}, {pipeline_mode = #tpu.pipeline_mode<synchronous>, transform_indices = @transform_3, window_bounds = array<i64: 512, 512>}, {pipeline_mode = #tpu.pipeline_mode<synchronous>, transform_indices = @transform_4, window_bounds = array<i64: 1, 512>}, {pipeline_mode = #tpu.pipeline_mode<synchronous>, transform_indices = @transform_5, window_bounds = array<i64: 512, 128>}, {pipeline_mode = #tpu.pipeline_mode<synchronous>, transform_indices = @transform_6, window_bounds = array<i64: 1, 128>}, {transform_indices = @transform_7, window_bounds = array<i64: 128, 128>}]} {
    %c0 = arith.constant 0 : index
    %c0_0 = arith.constant 0 : index
    %0 = vector.load %arg1[%c0, %c0_0] : memref<128x896xbf16, #tpu.memory_space<vmem>>, vector<128x896xbf16>
    %c0_1 = arith.constant 0 : index
    %c0_2 = arith.constant 0 : index
    %1 = vector.load %arg2[%c0_1, %c0_2] : memref<896x512xbf16, #tpu.memory_space<vmem>>, vector<896x512xbf16>
    %cst = arith.constant dense<0.000000e+00> : vector<128x512xf32>
    %2 = tpu.matmul %0, %1, %cst {dimension_numbers = #tpu.dot_dimension_numbers<[1], [0], [0], [1], [0, 0, 1, 1], [], []>} : vector<128x896xbf16>, vector<896x512xbf16>, vector<128x512xf32> -> vector<128x512xf32>
    %c0_3 = arith.constant 0 : index
    %c0_4 = arith.constant 0 : index
    %3 = vector.load %arg3[%c0_3, %c0_4] : memref<1x512xf32, #tpu.memory_space<vmem>>, vector<1x512xf32>
    %4 = vector.broadcast %3 : vector<1x512xf32> to vector<128x512xf32>
    %5 = arith.addf %2, %4 : vector<128x512xf32>
    %cst_5 = arith.constant 0.000000e+00 : f32
    %6 = vector.broadcast %cst_5 : f32 to vector<128x512xf32>
    %7 = arith.maximumf %5, %6 : vector<128x512xf32>
    %8 = arith.truncf %7 : vector<128x512xf32> to vector<128x512xbf16>
    %c0_6 = arith.constant 0 : index
    %c0_7 = arith.constant 0 : index
    %9 = vector.load %arg4[%c0_6, %c0_7] : memref<512x512xbf16, #tpu.memory_space<vmem>>, vector<512x512xbf16>
    %cst_8 = arith.constant dense<0.000000e+00> : vector<128x512xf32>
    %10 = tpu.matmul %8, %9, %cst_8 {dimension_numbers = #tpu.dot_dimension_numbers<[1], [0], [0], [1], [0, 0, 1, 1], [], []>} : vector<128x512xbf16>, vector<512x512xbf16>, vector<128x512xf32> -> vector<128x512xf32>
    %c0_9 = arith.constant 0 : index
    %c0_10 = arith.constant 0 : index
    %11 = vector.load %arg5[%c0_9, %c0_10] : memref<1x512xf32, #tpu.memory_space<vmem>>, vector<1x512xf32>
    %12 = vector.broadcast %11 : vector<1x512xf32> to vector<128x512xf32>
    %13 = arith.addf %10, %12 : vector<128x512xf32>
    %cst_11 = arith.constant 0.000000e+00 : f32
    %14 = vector.broadcast %cst_11 : f32 to vector<128x512xf32>
    %15 = arith.maximumf %13, %14 : vector<128x512xf32>
    %16 = arith.truncf %15 : vector<128x512xf32> to vector<128x512xbf16>
    %c0_12 = arith.constant 0 : index
    %c0_13 = arith.constant 0 : index
    %17 = vector.load %arg6[%c0_12, %c0_13] : memref<512x128xbf16, #tpu.memory_space<vmem>>, vector<512x128xbf16>
    %cst_14 = arith.constant dense<0.000000e+00> : vector<128x128xf32>
    %18 = tpu.matmul %16, %17, %cst_14 {dimension_numbers = #tpu.dot_dimension_numbers<[1], [0], [0], [1], [0, 0, 1, 1], [], []>} : vector<128x512xbf16>, vector<512x128xbf16>, vector<128x128xf32> -> vector<128x128xf32>
    %c0_15 = arith.constant 0 : index
    %c0_16 = arith.constant 0 : index
    %19 = vector.load %arg7[%c0_15, %c0_16] : memref<1x128xf32, #tpu.memory_space<vmem>>, vector<1x128xf32>
    %20 = vector.broadcast %19 : vector<1x128xf32> to vector<128x128xf32>
    %21 = arith.addf %18, %20 : vector<128x128xf32>
    %c0_17 = arith.constant 0 : index
    %c0_18 = arith.constant 0 : index
    %22 = vector.load %arg8[%c0_17, %c0_18] : memref<128x128xf32, #tpu.memory_space<vmem>>, vector<128x128xf32>
    tpu.vector_store %arg8[%c0_17, %c0_18], %21 {strides = array<i32>} : memref<128x128xf32, #tpu.memory_space<vmem>>, vector<128x128xf32>,
    return
  }
  func.func @transform_0(%arg0: i32) -> (i32, i32) {
    %c0_i32 = arith.constant 0 : i32
    %c0_i32_0 = arith.constant 0 : i32
    return %arg0, %c0_i32 : i32, i32
  }
  func.func @transform_1(%arg0: i32) -> (i32, i32) {
    %c0_i32 = arith.constant 0 : i32
    %c0_i32_0 = arith.constant 0 : i32
    %c0_i32_1 = arith.constant 0 : i32
    return %c0_i32, %c0_i32_0 : i32, i32
  }
  func.func @transform_2(%arg0: i32) -> (i32, i32) {
    %c0_i32 = arith.constant 0 : i32
    %c0_i32_0 = arith.constant 0 : i32
    %c0_i32_1 = arith.constant 0 : i32
    return %c0_i32, %c0_i32_0 : i32, i32
  }
  func.func @transform_3(%arg0: i32) -> (i32, i32) {
    %c0_i32 = arith.constant 0 : i32
    %c0_i32_0 = arith.constant 0 : i32
    %c0_i32_1 = arith.constant 0 : i32
    return %c0_i32, %c0_i32_0 : i32, i32
  }
  func.func @transform_4(%arg0: i32) -> (i32, i32) {
    %c0_i32 = arith.constant 0 : i32
    %c0_i32_0 = arith.constant 0 : i32
    %c0_i32_1 = arith.constant 0 : i32
    return %c0_i32, %c0_i32_0 : i32, i32
  }
  func.func @transform_5(%arg0: i32) -> (i32, i32) {
    %c0_i32 = arith.constant 0 : i32
    %c0_i32_0 = arith.constant 0 : i32
    %c0_i32_1 = arith.constant 0 : i32
    return %c0_i32, %c0_i32_0 : i32, i32
  }
  func.func @transform_6(%arg0: i32) -> (i32, i32) {
    %c0_i32 = arith.constant 0 : i32
    %c0_i32_0 = arith.constant 0 : i32
    %c0_i32_1 = arith.constant 0 : i32
    return %c0_i32, %c0_i32_0 : i32, i32
  }
  func.func @transform_7(%arg0: i32) -> (i32, i32) {
    %c0_i32 = arith.constant 0 : i32
    %c0_i32_0 = arith.constant 0 : i32
    return %arg0, %c0_i32 : i32, i32
  }
}

</mosaic_0001>

<bundles_post_ra>
// kernel: tpu_custom_call.1
= control target key start
LH: loop header
LB: loop body
LE: loop exit
PB: predicated region body
PF: predicated region fallthrough
CT: control target
= control target key end

     0   :  { %12 = vsyncpa [#allocation3], 0  ;;  %s6756_s0 = inlined_call_operand.hbm [shape: bf16[128,896], index: 0, kind: input, shape index: {}]   ;;  %s6757_s1 = inlined_call_operand.hbm [shape: bf16[896,512], index: 1, kind: input, shape index: {}]   ;;  %s6758_s2 = inlined_call_operand.vmem [shape: f32[1,512], index: 2, kind: input, shape index: {}]   ;;  %s6759_s3 = inlined_call_operand.hbm [shape: bf16[512,512], index: 3, kind: input, shape index: {}]   ;;  %s6760_s4 = inlined_call_operand.vmem [shape: f32[1,512], index: 4, kind: input, shape index: {}]   ;;  %s6761_s5 = inlined_call_operand.hbm [shape: bf16[512,128], index: 5, kind: input, shape index: {}]   ;;  %s6762_s6 = inlined_call_operand.vmem [shape: f32[1,128], index: 6, kind: input, shape index: {}]   ;;  %s6763_s7 = inlined_call_operand.hbm [shape: f32[128,128], index: 7, kind: output, shape index: {}]  }
   0x1   :  { %13 = vsyncpa [#allocation6], 0 }
   0x2   :  { %14 = vsyncpa [#allocation9], 0 }
   0x3   :  { %15 = vsyncpa [#allocation4], 0  ;;  %s6356_s24 = smov [#allocation5]   ;;  %s6238_s28 = scalar_lea.hbm %s6757_s1, 28672 }
   0x4   :  { %s33_s25 = sshll.u32 %s6356_s24, 4  ;;  %p6239_p0 = scmp.ne.s32.totalorder %s6757_s1, %s6238_s28  ;;  %s34_s25 = int_to_ptr.vmem [resolvable:$true] %s33_s25 }
   0x5   :  { %p6242_p1 = scmp.lt.u32.totalorder %s6238_s28, %s6757_s1 }
   0x7   :  { %p6244_p2 = pnand %p6242_p1, %p6239_p0 }
   0x9   :  { %6247 = shalt.err (!%p6244_p2)
}
   0xa   :  { %s6248_s10 = scalar_lea.vmem %s34_s25, 28672  ;;  %p6253_p4 = scmp.lt.s32.totalorder %s34_s25, %s34_s25 }
   0xb   :  { %p6249_p3 = scmp.ne.s32.totalorder %s34_s25, %s6248_s10  ;;  %p6254_p5 = scmp.lt.s32.totalorder %s6248_s10, %s6248_s10 }
   0xd   :  { %p6255_p6 = por %p6254_p5, %p6253_p4 }
   0xf   :  { %p6256_p7 = pnand %p6255_p6, %p6249_p3 }
  0x11   :  { %6259 = shalt.err (!%p6256_p7)
}
  0x12   :  { %s6357_s11 = smov 256   ;;  %s6358_s12 = smov 16  }
  0x13   :  { %39 = dma.hbm_to_vmem [thread:$0]  %s6757_s1, 28672, %s34_s25, [#allocation6], %s6357_s11, %s6357_s11, %s6358_s12  }
  0x14   :  { %s6359_s15 = smov [#allocation2]   ;;  %s6260_s19 = scalar_lea.hbm %s6756_s0, 7168 }
  0x15   :  { %s21_s16 = sshll.u32 %s6359_s15, 4  ;;  %p6261_p8 = scmp.ne.s32.totalorder %s6756_s0, %s6260_s19  ;;  %s22_s16 = int_to_ptr.vmem [resolvable:$true] %s21_s16 }
  0x16   :  { %p6264_p9 = scmp.lt.u32.totalorder %s6260_s19, %s6756_s0 }
  0x18   :  { %p6266_p10 = pnand %p6264_p9, %p6261_p8 }
  0x1a   :  { %6269 = shalt.err (!%p6266_p10)
}
  0x1b   :  { %s6270_s24 = scalar_lea.vmem %s22_s16, 7168  ;;  %p6275_p12 = scmp.lt.s32.totalorder %s22_s16, %s22_s16 }
  0x1c   :  { %p6271_p11 = scmp.ne.s32.totalorder %s22_s16, %s6270_s24  ;;  %p6276_p13 = scmp.lt.s32.totalorder %s6270_s24, %s6270_s24 }
  0x1e   :  { %p6277_p0 = por %p6276_p13, %p6275_p12 }
  0x20   :  { %p6278_p1 = pnand %p6277_p0, %p6271_p11 }
  0x22   :  { %6281 = shalt.err (!%p6278_p1)
}
  0x23   :  { %s6360_s1 = smov 448   ;;  %s6361_s25 = smov 28  }
  0x24   :  { %27 = dma.hbm_to_vmem [thread:$0]  %s6756_s0, 7168, %s22_s16, [#allocation3], %s6360_s1, %s6360_s1, %s6361_s25  }
  0x25   :  { %s6362_s28 = smov [#allocation7]   ;;  %s6363_s30 = smov [#allocation8]  }
  0x26   :  { %s47_s29 = sshll.u32 %s6362_s28, 4  ;;  %s61_s8 = sshll.u32 %s6363_s30, 4  ;;  %s48_s29 = int_to_ptr.vmem [resolvable:$true] %s47_s29  ;;  %s6437_s8 = int_to_ptr.vmem [resolvable:$true] %s61_s8 }
  0x27   :  { %s6282_s13 = scalar_lea.hbm %s6759_s3, 16384 }
  0x28   :  { %p6283_p2 = scmp.ne.s32.totalorder %s6759_s3, %s6282_s13  ;;  %p6286_p3 = scmp.lt.u32.totalorder %s6282_s13, %s6759_s3 }
  0x2a   :  { %p6288_p4 = pnand %p6286_p3, %p6283_p2 }
  0x2c   :  { %6291 = shalt.err (!%p6288_p4)
}
  0x2d   :  { %s6292_s0 = scalar_lea.vmem %s48_s29, 16384  ;;  %p6297_p6 = scmp.lt.s32.totalorder %s48_s29, %s48_s29 }
  0x2e   :  { %p6293_p5 = scmp.ne.s32.totalorder %s48_s29, %s6292_s0  ;;  %p6298_p7 = scmp.lt.s32.totalorder %s6292_s0, %s6292_s0 }
  0x30   :  { %p6299_p8 = por %p6298_p7, %p6297_p6 }
  0x32   :  { %p6300_p9 = pnand %p6299_p8, %p6293_p5 }
  0x34   :  { %6303 = shalt.err (!%p6300_p9)
}
  0x35   :  { %53 = dma.hbm_to_vmem [thread:$0]  %s6759_s3, 16384, %s48_s29, [#allocation6], %s6357_s11, %s6357_s11, %s6358_s12  }
  0x36   :  { %s6304_s22 = scalar_lea.hbm %s6761_s5, 4096 }
  0x37   :  { %p6305_p10 = scmp.ne.s32.totalorder %s6761_s5, %s6304_s22  ;;  %p6308_p11 = scmp.lt.u32.totalorder %s6304_s22, %s6761_s5 }
  0x39   :  { %p6310_p12 = pnand %p6308_p11, %p6305_p10 }
  0x3b   :  { %6313 = shalt.err (!%p6310_p12)
}
  0x3c   :  { %s6314_s26 = scalar_lea.vmem %s6437_s8, 4096  ;;  %p6319_p0 = scmp.lt.s32.totalorder %s6437_s8, %s6437_s8 }
  0x3d   :  { %p6315_p13 = scmp.ne.s32.totalorder %s6437_s8, %s6314_s26  ;;  %p6320_p1 = scmp.lt.s32.totalorder %s6314_s26, %s6314_s26 }
  0x3f   :  { %p6321_p2 = por %p6320_p1, %p6319_p0 }
  0x41   :  { %p6322_p3 = pnand %p6321_p2, %p6315_p13 }
  0x43   :  { %6325 = shalt.err (!%p6322_p3)
}
  0x44   :  { %s6364_s3 = smov 64   ;;  %s6365_s11 = smov 4  }
  0x45   :  { %67 = dma.hbm_to_vmem [thread:$0]  %s6761_s5, 4096, %s6437_s8, [#allocation9], %s6364_s3, %s6364_s3, %s6365_s11  }
  0x46   :  { %6348 = dma.done.wait [#allocation3], 7168  }
  0x47   :  { %6349 = vsyncadd [#allocation3], 4294960128 }
  0x48   :  { %6350 = dma.done.wait [#allocation6], 45056  }
  0x49   :  { %6351 = vsyncadd [#allocation6], 4294922240 }
  0x4a   :  { %6352 = dma.done.wait [#allocation9], 4096  }
  0x4b   :  { %6353 = vsyncadd [#allocation9], 4294963200  ;;  %v5598_v0 = vld [vmem:[#allocation5 + $0x4] ss:$16 sps:$4 sm:$0xff]   ;;  %v5600_v1 = vld [vmem:[#allocation5 + $0xc] ss:$16 sps:$4 sm:$0xff]  }
  0x4c   :  { %1801 = vmatprep.subr.bf16.mxu0 %v5598_v0  ;;  %v5602_v2 = vld [vmem:[#allocation5] ss:$16 sps:$4 sm:$0xff]   ;;  %v5603_v3 = vld [vmem:[#allocation5 + $0x8] ss:$16 sps:$4 sm:$0xff]   ;;  %2253 = vmatprep.subr.bf16.mxu1 %v5600_v1  ;;  %v5604_v4 = vld [vmem:[#allocation5 + $0x24] ss:$16 sps:$4 sm:$0xff]  }
  0x4d   :  { %1802 = vmatpush1.bf16.msra.mxu0 %v5602_v2  ;;  %2254 = vmatpush1.bf16.msra.mxu1 %v5603_v3  ;;  %v5606_v5 = vld [vmem:[#allocation5 + $0x2c] ss:$16 sps:$4 sm:$0xff]   ;;  %v5608_v6 = vld [vmem:[#allocation5 + $0x20] ss:$16 sps:$4 sm:$0xff]   ;;  %v5609_v7 = vld [vmem:[#allocation5 + $0x28] ss:$16 sps:$4 sm:$0xff]  }
  0x4e   :  { %1803 = vmatprep.subr.bf16.mxu0 %v5604_v4  ;;  %2255 = vmatprep.subr.bf16.mxu1 %v5606_v5  ;;  %v5610_v8 = vld [vmem:[#allocation5 + $0x44] ss:$16 sps:$4 sm:$0xff]   ;;  %v5612_v9 = vld [vmem:[#allocation5 + $0x4c] ss:$16 sps:$4 sm:$0xff]   ;;  %v5614_v10 = vld [vmem:[#allocation5 + $0x40] ss:$16 sps:$4 sm:$0xff]  }
  0x4f   :  { %v5615_v11 = vld [vmem:[#allocation5 + $0x48] ss:$16 sps:$4 sm:$0xff]   ;;  %v5616_v12 = vld [vmem:[#allocation5 + $0x64] ss:$16 sps:$4 sm:$0xff]   ;;  %v5618_v13 = vld [vmem:[#allocation5 + $0x6c] ss:$16 sps:$4 sm:$0xff]  }
  0x50   :  { %v5620_v14 = vld [vmem:[#allocation5 + $0x60] ss:$16 sps:$4 sm:$0xff]   ;;  %v5621_v15 = vld [vmem:[#allocation5 + $0x68] ss:$16 sps:$4 sm:$0xff]   ;;  %v5622_v16 = vld [vmem:[#allocation5 + $0x84] ss:$16 sps:$4 sm:$0xff]  }
  0x51   :  { %1804 = vmatpush1.bf16.msra.mxu0 %v5608_v6  ;;  %2256 = vmatpush1.bf16.msra.mxu1 %v5609_v7  ;;  %v5624_v17 = vld [vmem:[#allocation5 + $0x8c] ss:$16 sps:$4 sm:$0xff]   ;;  %v5626_v18 = vld [vmem:[#allocation5 + $0x80] ss:$16 sps:$4 sm:$0xff]   ;;  %v5627_v19 = vld [vmem:[#allocation5 + $0x88] ss:$16 sps:$4 sm:$0xff]  }
  0x52   :  { %1805 = vmatprep.subr.bf16.mxu0 %v5610_v8  ;;  %2257 = vmatprep.subr.bf16.mxu1 %v5612_v9  ;;  %v5628_v20 = vld [vmem:[#allocation5 + $0xa4] ss:$16 sps:$4 sm:$0xff]   ;;  %v5630_v21 = vld [vmem:[#allocation5 + $0xac] ss:$16 sps:$4 sm:$0xff]   ;;  %v5632_v22 = vld [vmem:[#allocation5 + $0xa0] ss:$16 sps:$4 sm:$0xff]  }
  0x53   :  { %v5633_v23 = vld [vmem:[#allocation5 + $0xa8] ss:$16 sps:$4 sm:$0xff]   ;;  %v5634_v24 = vld [vmem:[#allocation5 + $0xc4] ss:$16 sps:$4 sm:$0xff]   ;;  %v5636_v25 = vld [vmem:[#allocation5 + $0xcc] ss:$16 sps:$4 sm:$0xff]  }
  0x54   :  { %v5638_v26 = vld [vmem:[#allocation5 + $0xc0] ss:$16 sps:$4 sm:$0xff]   ;;  %v5639_v27 = vld [vmem:[#allocation5 + $0xc8] ss:$16 sps:$4 sm:$0xff]   ;;  %v5640_v28 = vld [vmem:[#allocation5 + $0xe4] ss:$16 sps:$4 sm:$0xff]  }
  0x55   :  { %1806 = vmatpush1.bf16.msra.mxu0 %v5614_v10  ;;  %2258 = vmatpush1.bf16.msra.mxu1 %v5615_v11  ;;  %v5642_v29 = vld [vmem:[#allocation5 + $0xec] ss:$16 sps:$4 sm:$0xff]   ;;  %v5644_v30 = vld [vmem:[#allocation5 + $0xe0] ss:$16 sps:$4 sm:$0xff]   ;;  %v5645_v31 = vld [vmem:[#allocation5 + $0xe8] ss:$16 sps:$4 sm:$0xff]  }
  0x56   :  { %1807 = vmatprep.subr.bf16.mxu0 %v5616_v12  ;;  %2259 = vmatprep.subr.bf16.mxu1 %v5618_v13  ;;  %v5646_v32 = vld [vmem:[#allocation5 + $0x104] ss:$16 sps:$4 sm:$0xff]   ;;  %v5648_v33 = vld [vmem:[#allocation5 + $0x10c] ss:$16 sps:$4 sm:$0xff]   ;;  %v5650_v34 = vld [vmem:[#allocation5 + $0x100] ss:$16 sps:$4 sm:$0xff]  }
  0x57   :  { %v5651_v35 = vld [vmem:[#allocation5 + $0x108] ss:$16 sps:$4 sm:$0xff]   ;;  %v5652_v36 = vld [vmem:[#allocation5 + $0x124] ss:$16 sps:$4 sm:$0xff]   ;;  %v5654_v37 = vld [vmem:[#allocation5 + $0x12c] ss:$16 sps:$4 sm:$0xff]  }
  0x58   :  { %v5656_v38 = vld [vmem:[#allocation5 + $0x120] ss:$16 sps:$4 sm:$0xff]   ;;  %v5657_v39 = vld [vmem:[#allocation5 + $0x128] ss:$16 sps:$4 sm:$0xff]   ;;  %v5658_v40 = vld [vmem:[#allocation5 + $0x144] ss:$16 sps:$4 sm:$0xff]  }
  0x59   :  { %1808 = vmatpush1.bf16.msra.mxu0 %v5620_v14  ;;  %2260 = vmatpush1.bf16.msra.mxu1 %v5621_v15  ;;  %v5660_v41 = vld [vmem:[#allocation5 + $0x14c] ss:$16 sps:$4 sm:$0xff]   ;;  %v5662_v42 = vld [vmem:[#allocation5 + $0x140] ss:$16 sps:$4 sm:$0xff]   ;;  %v5663_v43 = vld [vmem:[#allocation5 + $0x148] ss:$16 sps:$4 sm:$0xff]  }
  0x5a   :  { %1809 = vmatprep.subr.bf16.mxu0 %v5622_v16  ;;  %2261 = vmatprep.subr.bf16.mxu1 %v5624_v17  ;;  %v5664_v44 = vld [vmem:[#allocation5 + $0x164] ss:$16 sps:$4 sm:$0xff]   ;;  %v5666_v45 = vld [vmem:[#allocation5 + $0x16c] ss:$16 sps:$4 sm:$0xff]   ;;  %v5668_v46 = vld [vmem:[#allocation5 + $0x160] ss:$16 sps:$4 sm:$0xff]  }
  0x5b   :  { %v5669_v47 = vld [vmem:[#allocation5 + $0x168] ss:$16 sps:$4 sm:$0xff]   ;;  %v5696_v48 = vld [vmem:[#allocation2 + $0x4] ss:$28 sps:$4 sm:$0xff]   ;;  %v5672_v50 = vld [vmem:[#allocation5 + $0x18c] ss:$16 sps:$4 sm:$0xff]  }
  0x5c   :  { %v5670_v49 = vld [vmem:[#allocation5 + $0x184] ss:$16 sps:$4 sm:$0xff]   ;;  %1833 = vmatprep.mubr.bf16.mxu0 %v5696_v48  ;;  %2285 = vmatprep.mubr.bf16.mxu1 %v5696_v48  ;;  %v5674_v51 = vld [vmem:[#allocation5 + $0x180] ss:$16 sps:$4 sm:$0xff]   ;;  %v5675_v52 = vld [vmem:[#allocation5 + $0x188] ss:$16 sps:$4 sm:$0xff]  }
  0x5d   :  { %1810 = vmatpush1.bf16.msra.mxu0 %v5626_v18  ;;  %2262 = vmatpush1.bf16.msra.mxu1 %v5627_v19  ;;  %v5676_v53 = vld [vmem:[#allocation5 + $0x1a4] ss:$16 sps:$4 sm:$0xff]   ;;  %v5678_v54 = vld [vmem:[#allocation5 + $0x1ac] ss:$16 sps:$4 sm:$0xff]   ;;  %v5680_v55 = vld [vmem:[#allocation5 + $0x1a0] ss:$16 sps:$4 sm:$0xff]  }
  0x5e   :  { %1811 = vmatprep.subr.bf16.mxu0 %v5628_v20  ;;  %2263 = vmatprep.subr.bf16.mxu1 %v5630_v21  ;;  %v5681_v56 = vld [vmem:[#allocation5 + $0x1a8] ss:$16 sps:$4 sm:$0xff]   ;;  %v5682_v57 = vld [vmem:[#allocation5 + $0x1c4] ss:$16 sps:$4 sm:$0xff]   ;;  %v5684_v58 = vld [vmem:[#allocation5 + $0x1cc] ss:$16 sps:$4 sm:$0xff]  }
  0x5f   :  { %v5686_v59 = vld [vmem:[#allocation5 + $0x1c0] ss:$16 sps:$4 sm:$0xff]   ;;  %v5687_v60 = vld [vmem:[#allocation5 + $0x1c8] ss:$16 sps:$4 sm:$0xff]   ;;  %v5688_v61 = vld [vmem:[#allocation5 + $0x1e4] ss:$16 sps:$4 sm:$0xff]  }
  0x60   :  { %v5690_v62 = vld [vmem:[#allocation5 + $0x1ec] ss:$16 sps:$4 sm:$0xff]   ;;  %v5692_v63 = vld [vmem:[#allocation5 + $0x1e0] ss:$16 sps:$4 sm:$0xff]   ;;  %v5693_v0 = vld [vmem:[#allocation5 + $0x1e8] ss:$16 sps:$4 sm:$0xff]  }
  0x61   :  { %1812 = vmatpush1.bf16.msra.mxu0 %v5632_v22  ;;  %2264 = vmatpush1.bf16.msra.mxu1 %v5633_v23  ;;  %v5699_v1 = vld [vmem:[#allocation5 + $0x204] ss:$16 sps:$4 sm:$0xff]   ;;  %v5702_v2 = vld [vmem:[#allocation5 + $0x20c] ss:$16 sps:$4 sm:$0xff]   ;;  %v5697_v4 = vld [vmem:[#allocation5 + $0x200] ss:$16 sps:$4 sm:$0xff]  }
  0x62   :  { %1813 = vmatprep.subr.bf16.mxu0 %v5634_v24  ;;  %2265 = vmatprep.subr.bf16.mxu1 %v5636_v25  ;;  %v5694_v3 = vld [vmem:[#allocation2] ss:$28 sps:$4 sm:$0xff]   ;;  %v5700_v5 = vld [vmem:[#allocation5 + $0x208] ss:$16 sps:$4 sm:$0xff]   ;;  %v5705_v6 = vld [vmem:[#allocation5 + $0x224] ss:$16 sps:$4 sm:$0xff]  }
  0x63   :  { %v5708_v7 = vld [vmem:[#allocation5 + $0x22c] ss:$16 sps:$4 sm:$0xff]   ;;  %v5703_v9 = vld [vmem:[#allocation5 + $0x220] ss:$16 sps:$4 sm:$0xff]   ;;  %v5706_v10 = vld [vmem:[#allocation5 + $0x228] ss:$16 sps:$4 sm:$0xff]  }
  0x64   :  { %v5709_v8 = vld [vmem:[#allocation2 + $0x3c] ss:$28 sps:$4 sm:$0xff]   ;;  %v5714_v11 = vld [vmem:[#allocation5 + $0x244] ss:$16 sps:$4 sm:$0xff]   ;;  %v5712_v14 = vld [vmem:[#allocation5 + $0x240] ss:$16 sps:$4 sm:$0xff]  }
  0x65   :  { %1814 = vmatpush1.bf16.msra.mxu0 %v5638_v26  ;;  %2266 = vmatpush1.bf16.msra.mxu1 %v5639_v27  ;;  %v5717_v12 = vld [vmem:[#allocation5 + $0x24c] ss:$16 sps:$4 sm:$0xff]   ;;  %v5711_v13 = vld [vmem:[#allocation2 + $0x38] ss:$28 sps:$4 sm:$0xff]   ;;  %v5718_v19 = vld [vmem:[#allocation5 + $0x260] ss:$16 sps:$4 sm:$0xff]  }
  0x66   :  { %1815 = vmatprep.subr.bf16.mxu0 %v5640_v28  ;;  %2267 = vmatprep.subr.bf16.mxu1 %v5642_v29  ;;  %v5715_v15 = vld [vmem:[#allocation5 + $0x248] ss:$16 sps:$4 sm:$0xff]   ;;  %v5720_v16 = vld [vmem:[#allocation5 + $0x264] ss:$16 sps:$4 sm:$0xff]   ;;  %v5723_v17 = vld [vmem:[#allocation5 + $0x26c] ss:$16 sps:$4 sm:$0xff]  }
  0x67   :  { %v5724_v18 = vld [vmem:[#allocation2 + $0x74] ss:$28 sps:$4 sm:$0xff]   ;;  %v5721_v20 = vld [vmem:[#allocation5 + $0x268] ss:$16 sps:$4 sm:$0xff]   ;;  %v5732_v22 = vld [vmem:[#allocation5 + $0x28c] ss:$16 sps:$4 sm:$0xff]  }
  0x68   :  { %v5729_v21 = vld [vmem:[#allocation5 + $0x284] ss:$16 sps:$4 sm:$0xff]   ;;  %v5726_v23 = vld [vmem:[#allocation2 + $0x70] ss:$28 sps:$4 sm:$0xff]   ;;  %v5730_v25 = vld [vmem:[#allocation5 + $0x288] ss:$16 sps:$4 sm:$0xff]  }
  0x69   :  { %1816 = vmatpush1.bf16.msra.mxu0 %v5644_v30  ;;  %2268 = vmatpush1.bf16.msra.mxu1 %v5645_v31  ;;  %v5727_v24 = vld [vmem:[#allocation5 + $0x280] ss:$16 sps:$4 sm:$0xff]   ;;  %v5735_v26 = vld [vmem:[#allocation5 + $0x2a4] ss:$16 sps:$4 sm:$0xff]   ;;  %v5738_v27 = vld [vmem:[#allocation5 + $0x2ac] ss:$16 sps:$4 sm:$0xff]  }
  0x6a   :  { %1817 = vmatprep.subr.bf16.mxu0 %v5646_v32  ;;  %2269 = vmatprep.subr.bf16.mxu1 %v5648_v33  ;;  %v5739_v28 = vld [vmem:[#allocation2 + $0xac] ss:$28 sps:$4 sm:$0xff]   ;;  %v5733_v29 = vld [vmem:[#allocation5 + $0x2a0] ss:$16 sps:$4 sm:$0xff]   ;;  %v5744_v31 = vld [vmem:[#allocation5 + $0x2c4] ss:$16 sps:$4 sm:$0xff]  }
  0x6b   :  { %v5736_v30 = vld [vmem:[#allocation5 + $0x2a8] ss:$16 sps:$4 sm:$0xff]   ;;  %v5747_v32 = vld [vmem:[#allocation5 + $0x2cc] ss:$16 sps:$4 sm:$0xff]  }
  0x6c   :  { %v5741_v33 = vld [vmem:[#allocation2 + $0xa8] ss:$28 sps:$4 sm:$0xff]   ;;  %v5769_v48 = vld [vmem:[#allocation2 + $0x11c] ss:$28 sps:$4 sm:$0xff]  }
  0x6d   :  { %1818 = vmatpush1.bf16.msra.mxu0 %v5650_v34  ;;  %2270 = vmatpush1.bf16.msra.mxu1 %v5651_v35  ;;  %v5742_v34 = vld [vmem:[#allocation5 + $0x2c0] ss:$16 sps:$4 sm:$0xff]   ;;  %v5745_v35 = vld [vmem:[#allocation5 + $0x2c8] ss:$16 sps:$4 sm:$0xff]  }
  0x6e   :  { %1819 = vmatprep.subr.bf16.mxu0 %v5652_v36  ;;  %2271 = vmatprep.subr.bf16.mxu1 %v5654_v37  ;;  %v5750_v36 = vld [vmem:[#allocation5 + $0x2e4] ss:$16 sps:$4 sm:$0xff]   ;;  %v5753_v37 = vld [vmem:[#allocation5 + $0x2ec] ss:$16 sps:$4 sm:$0xff]  }
  0x71   :  { %1820 = vmatpush1.bf16.msra.mxu0 %v5656_v38  ;;  %2272 = vmatpush1.bf16.msra.mxu1 %v5657_v39  ;;  %v5754_v38 = vld [vmem:[#allocation2 + $0xe4] ss:$28 sps:$4 sm:$0xff]  }
  0x72   :  { %1821 = vmatprep.subr.bf16.mxu0 %v5658_v40  ;;  %2273 = vmatprep.subr.bf16.mxu1 %v5660_v41  ;;  %v5748_v39 = vld [vmem:[#allocation5 + $0x2e0] ss:$16 sps:$4 sm:$0xff]   ;;  %v5751_v40 = vld [vmem:[#allocation5 + $0x2e8] ss:$16 sps:$4 sm:$0xff]   ;;  %v5759_v41 = vld [vmem:[#allocation5 + $0x304] ss:$16 sps:$4 sm:$0xff]  }
  0x75   :  { %1822 = vmatpush1.bf16.msra.mxu0 %v5662_v42  ;;  %2274 = vmatpush1.bf16.msra.mxu1 %v5663_v43  ;;  %v5762_v42 = vld [vmem:[#allocation5 + $0x30c] ss:$16 sps:$4 sm:$0xff]  }
  0x76   :  { %1823 = vmatprep.subr.bf16.mxu0 %v5664_v44  ;;  %2275 = vmatprep.subr.bf16.mxu1 %v5666_v45  ;;  %v5756_v43 = vld [vmem:[#allocation2 + $0xe0] ss:$28 sps:$4 sm:$0xff]   ;;  %v5760_v45 = vld [vmem:[#allocation5 + $0x308] ss:$16 sps:$4 sm:$0xff]  }
  0x77   :  { %v5757_v44 = vld [vmem:[#allocation5 + $0x300] ss:$16 sps:$4 sm:$0xff]  }
  0x79   :  { %1824 = vmatpush1.bf16.msra.mxu0 %v5668_v46  ;;  %2276 = vmatpush1.bf16.msra.mxu1 %v5669_v47  ;;  %v5765_v46 = vld [vmem:[#allocation5 + $0x324] ss:$16 sps:$4 sm:$0xff]   ;;  %v5768_v47 = vld [vmem:[#allocation5 + $0x32c] ss:$16 sps:$4 sm:$0xff]  }
  0x7a   :  { %1825 = vmatprep.subr.bf16.mxu0 %v5670_v49  ;;  %2277 = vmatprep.subr.bf16.mxu1 %v5672_v50  ;;  %v5763_v49 = vld [vmem:[#allocation5 + $0x320] ss:$16 sps:$4 sm:$0xff]   ;;  %v5766_v50 = vld [vmem:[#allocation5 + $0x328] ss:$16 sps:$4 sm:$0xff]  }
  0x7d   :  { %1826 = vmatpush1.bf16.msra.mxu0 %v5674_v51  ;;  %2278 = vmatpush1.bf16.msra.mxu1 %v5675_v52  ;;  %v5774_v51 = vld [vmem:[#allocation5 + $0x344] ss:$16 sps:$4 sm:$0xff]   ;;  %v5777_v52 = vld [vmem:[#allocation5 + $0x34c] ss:$16 sps:$4 sm:$0xff]  }
  0x7e   :  { %1827 = vmatprep.subr.bf16.mxu0 %v5676_v53  ;;  %2279 = vmatprep.subr.bf16.mxu1 %v5678_v54  ;;  %v5771_v53 = vld [vmem:[#allocation2 + $0x118] ss:$28 sps:$4 sm:$0xff]   ;;  %v5772_v54 = vld [vmem:[#allocation5 + $0x340] ss:$16 sps:$4 sm:$0xff]  }
  0x81   :  { %1828 = vmatpush1.bf16.msra.mxu0 %v5680_v55  ;;  %2280 = vmatpush1.bf16.msra.mxu1 %v5681_v56  ;;  %v5775_v55 = vld [vmem:[#allocation5 + $0x348] ss:$16 sps:$4 sm:$0xff]   ;;  %v5780_v56 = vld [vmem:[#allocation5 + $0x364] ss:$16 sps:$4 sm:$0xff]  }
  0x82   :  { %1829 = vmatprep.subr.bf16.mxu0 %v5682_v57  ;;  %2281 = vmatprep.subr.bf16.mxu1 %v5684_v58  ;;  %v5783_v57 = vld [vmem:[#allocation5 + $0x36c] ss:$16 sps:$4 sm:$0xff]   ;;  %v5784_v58 = vld [vmem:[#allocation2 + $0x154] ss:$28 sps:$4 sm:$0xff]  }
  0x85   :  { %1830 = vmatpush1.bf16.msra.mxu0 %v5686_v59  ;;  %2282 = vmatpush1.bf16.msra.mxu1 %v5687_v60  ;;  %v5778_v59 = vld [vmem:[#allocation5 + $0x360] ss:$16 sps:$4 sm:$0xff]   ;;  %v5781_v60 = vld [vmem:[#allocation5 + $0x368] ss:$16 sps:$4 sm:$0xff]  }
  0x86   :  { %1831 = vmatprep.subr.bf16.mxu0 %v5688_v61  ;;  %2283 = vmatprep.subr.bf16.mxu1 %v5690_v62  ;;  %v5789_v61 = vld [vmem:[#allocation5 + $0x384] ss:$16 sps:$4 sm:$0xff]   ;;  %v5792_v62 = vld [vmem:[#allocation5 + $0x38c] ss:$16 sps:$4 sm:$0xff]  }
  0x89   :  { %1832 = vmatpush1.bf16.msra.mxu0 %v5692_v63  ;;  %2284 = vmatpush1.bf16.msra.mxu1 %v5693_v0  ;;  %v5786_v63 = vld [vmem:[#allocation2 + $0x150] ss:$28 sps:$4 sm:$0xff]  }
  0x8a   :  { %1914 = vmatprep.subr.bf16.mxu0 %v5699_v1  ;;  %2366 = vmatprep.subr.bf16.mxu1 %v5702_v2  ;;  %v5787_v0 = vld [vmem:[#allocation5 + $0x380] ss:$16 sps:$4 sm:$0xff]   ;;  %v5790_v1 = vld [vmem:[#allocation5 + $0x388] ss:$16 sps:$4 sm:$0xff]   ;;  %v5795_v2 = vld [vmem:[#allocation5 + $0x3a4] ss:$16 sps:$4 sm:$0xff]  }
  0x8c   :  { %1834 = vmatmul.mubr.bf16.vlgmr.msra.gmra.mrb[0].mxu0 %v5694_v3  ;;  %2286 = vmatmul.mubr.bf16.vlgmr.msra.gmra.mrb[0].mxu1 %v5694_v3  ;;  %v5798_v3 = vld [vmem:[#allocation5 + $0x3ac] ss:$16 sps:$4 sm:$0xff]  }
  0x8d   :  { %1915 = vmatpush1.bf16.msra.mxu0 %v5697_v4  ;;  %2367 = vmatpush1.bf16.msra.mxu1 %v5700_v5  ;;  %v5799_v4 = vld [vmem:[#allocation2 + $0x18c] ss:$28 sps:$4 sm:$0xff]   ;;  %v5793_v5 = vld [vmem:[#allocation5 + $0x3a0] ss:$16 sps:$4 sm:$0xff]  }
  0x8e   :  { %1916 = vmatprep.subr.bf16.mxu0 %v5705_v6  ;;  %2368 = vmatprep.subr.bf16.mxu1 %v5708_v7  ;;  %v5796_v6 = vld [vmem:[#allocation5 + $0x3a8] ss:$16 sps:$4 sm:$0xff]   ;;  %v5804_v7 = vld [vmem:[#allocation5 + $0x3c4] ss:$16 sps:$4 sm:$0xff]  }
  0x8f   :  { %1843 = vmatprep.mubr.bf16.mxu0 %v5709_v8  ;;  %2295 = vmatprep.mubr.bf16.mxu1 %v5709_v8  ;;  %v5807_v8 = vld [vmem:[#allocation5 + $0x3cc] ss:$16 sps:$4 sm:$0xff]  }
  0x91   :  { %1917 = vmatpush1.bf16.msra.mxu0 %v5703_v9  ;;  %2369 = vmatpush1.bf16.msra.mxu1 %v5706_v10  ;;  %v5801_v9 = vld [vmem:[#allocation2 + $0x188] ss:$28 sps:$4 sm:$0xff]   ;;  %v5802_v10 = vld [vmem:[#allocation5 + $0x3c0] ss:$16 sps:$4 sm:$0xff]  }
  0x92   :  { %1918 = vmatprep.subr.bf16.mxu0 %v5714_v11  ;;  %2370 = vmatprep.subr.bf16.mxu1 %v5717_v12  ;;  %v5805_v11 = vld [vmem:[#allocation5 + $0x3c8] ss:$16 sps:$4 sm:$0xff]   ;;  %v5810_v12 = vld [vmem:[#allocation5 + $0x3e4] ss:$16 sps:$4 sm:$0xff]  }
  0x94   :  { %1844 = vmatmul.mubr.bf16.gmra.mrb[4].mxu0 %v5711_v13  ;;  %2296 = vmatmul.mubr.bf16.gmra.mrb[4].mxu1 %v5711_v13  ;;  %v5813_v13 = vld [vmem:[#allocation5 + $0x3ec] ss:$16 sps:$4 sm:$0xff]  }
  0x95   :  { %1919 = vmatpush1.bf16.msra.mxu0 %v5712_v14  ;;  %2371 = vmatpush1.bf16.msra.mxu1 %v5715_v15  ;;  %v5816_v14 = vld [vmem:[#allocation2 + $0xc] ss:$28 sps:$4 sm:$0xff]   ;;  %v5808_v15 = vld [vmem:[#allocation5 + $0x3e0] ss:$16 sps:$4 sm:$0xff]  }
  0x96   :  { %1920 = vmatprep.subr.bf16.mxu0 %v5720_v16  ;;  %2372 = vmatprep.subr.bf16.mxu1 %v5723_v17  ;;  %v5811_v16 = vld [vmem:[#allocation5 + $0x3e8] ss:$16 sps:$4 sm:$0xff]   ;;  %v5819_v17 = vld [vmem:[#allocation5 + $0x404] ss:$16 sps:$4 sm:$0xff]  }
  0x97   :  { %1853 = vmatprep.mubr.bf16.mxu0 %v5724_v18  ;;  %2305 = vmatprep.mubr.bf16.mxu1 %v5724_v18  ;;  %v5822_v18 = vld [vmem:[#allocation5 + $0x40c] ss:$16 sps:$4 sm:$0xff]  }
  0x99   :  { %1921 = vmatpush1.bf16.msra.mxu0 %v5718_v19  ;;  %2373 = vmatpush1.bf16.msra.mxu1 %v5721_v20  ;;  %v5814_v19 = vld [vmem:[#allocation2 + $0x8] ss:$28 sps:$4 sm:$0xff]   ;;  %v5817_v20 = vld [vmem:[#allocation5 + $0x400] ss:$16 sps:$4 sm:$0xff]  }
  0x9a   :  { %1922 = vmatprep.subr.bf16.mxu0 %v5729_v21  ;;  %2374 = vmatprep.subr.bf16.mxu1 %v5732_v22  ;;  %v5820_v21 = vld [vmem:[#allocation5 + $0x408] ss:$16 sps:$4 sm:$0xff]   ;;  %v5825_v22 = vld [vmem:[#allocation5 + $0x424] ss:$16 sps:$4 sm:$0xff]  }
  0x9c   :  { %1854 = vmatmul.mubr.bf16.gmra.mrb[8].mxu0 %v5726_v23  ;;  %2306 = vmatmul.mubr.bf16.gmra.mrb[8].mxu1 %v5726_v23  ;;  %v5828_v23 = vld [vmem:[#allocation5 + $0x42c] ss:$16 sps:$4 sm:$0xff]  }
  0x9d   :  { %1923 = vmatpush1.bf16.msra.mxu0 %v5727_v24  ;;  %2375 = vmatpush1.bf16.msra.mxu1 %v5730_v25  ;;  %v5829_v24 = vld [vmem:[#allocation2 + $0x44] ss:$28 sps:$4 sm:$0xff]  }
  0x9e   :  { %1924 = vmatprep.subr.bf16.mxu0 %v5735_v26  ;;  %2376 = vmatprep.subr.bf16.mxu1 %v5738_v27  ;;  %v5823_v25 = vld [vmem:[#allocation5 + $0x420] ss:$16 sps:$4 sm:$0xff]   ;;  %v5826_v26 = vld [vmem:[#allocation5 + $0x428] ss:$16 sps:$4 sm:$0xff]   ;;  %v5834_v27 = vld [vmem:[#allocation5 + $0x444] ss:$16 sps:$4 sm:$0xff]  }
  0x9f   :  { %1863 = vmatprep.mubr.bf16.mxu0 %v5739_v28  ;;  %2315 = vmatprep.mubr.bf16.mxu1 %v5739_v28  ;;  %v5837_v28 = vld [vmem:[#allocation5 + $0x44c] ss:$16 sps:$4 sm:$0xff]  }
  0xa1   :  { %1925 = vmatpush1.bf16.msra.mxu0 %v5733_v29  ;;  %2377 = vmatpush1.bf16.msra.mxu1 %v5736_v30  ;;  %v5831_v29 = vld [vmem:[#allocation2 + $0x40] ss:$28 sps:$4 sm:$0xff]  }
  0xa2   :  { %1926 = vmatprep.subr.bf16.mxu0 %v5744_v31  ;;  %2378 = vmatprep.subr.bf16.mxu1 %v5747_v32  ;;  %v5832_v30 = vld [vmem:[#allocation5 + $0x440] ss:$16 sps:$4 sm:$0xff]   ;;  %v5835_v31 = vld [vmem:[#allocation5 + $0x448] ss:$16 sps:$4 sm:$0xff]   ;;  %v5840_v32 = vld [vmem:[#allocation5 + $0x464] ss:$16 sps:$4 sm:$0xff]  }
  0xa4   :  { %1864 = vmatmul.mubr.bf16.gmra.mrb[12].mxu0 %v5741_v33  ;;  %2316 = vmatmul.mubr.bf16.gmra.mrb[12].mxu1 %v5741_v33  ;;  %v5843_v33 = vld [vmem:[#allocation5 + $0x46c] ss:$16 sps:$4 sm:$0xff]  }
  0xa5   :  { %1927 = vmatpush1.bf16.msra.mxu0 %v5742_v34  ;;  %2379 = vmatpush1.bf16.msra.mxu1 %v5745_v35  ;;  %v5844_v34 = vld [vmem:[#allocation2 + $0x7c] ss:$28 sps:$4 sm:$0xff]   ;;  %v5838_v35 = vld [vmem:[#allocation5 + $0x460] ss:$16 sps:$4 sm:$0xff]  }
  0xa6   :  { %1928 = vmatprep.subr.bf16.mxu0 %v5750_v36  ;;  %2380 = vmatprep.subr.bf16.mxu1 %v5753_v37  ;;  %v5841_v36 = vld [vmem:[#allocation5 + $0x468] ss:$16 sps:$4 sm:$0xff]   ;;  %v5849_v37 = vld [vmem:[#allocation5 + $0x484] ss:$16 sps:$4 sm:$0xff]  }
  0xa7   :  { %1873 = vmatprep.mubr.bf16.mxu0 %v5754_v38  ;;  %2325 = vmatprep.mubr.bf16.mxu1 %v5754_v38  ;;  %v5852_v38 = vld [vmem:[#allocation5 + $0x48c] ss:$16 sps:$4 sm:$0xff]  }
  0xa9   :  { %1929 = vmatpush1.bf16.msra.mxu0 %v5748_v39  ;;  %2381 = vmatpush1.bf16.msra.mxu1 %v5751_v40  ;;  %v5846_v39 = vld [vmem:[#allocation2 + $0x78] ss:$28 sps:$4 sm:$0xff]   ;;  %v5847_v40 = vld [vmem:[#allocation5 + $0x480] ss:$16 sps:$4 sm:$0xff]  }
  0xaa   :  { %1930 = vmatprep.subr.bf16.mxu0 %v5759_v41  ;;  %2382 = vmatprep.subr.bf16.mxu1 %v5762_v42  ;;  %v5850_v41 = vld [vmem:[#allocation5 + $0x488] ss:$16 sps:$4 sm:$0xff]   ;;  %v5855_v42 = vld [vmem:[#allocation5 + $0x4a4] ss:$16 sps:$4 sm:$0xff]  }
  0xac   :  { %1874 = vmatmul.mubr.bf16.gmra.mrb[16].mxu0 %v5756_v43  ;;  %2326 = vmatmul.mubr.bf16.gmra.mrb[16].mxu1 %v5756_v43  ;;  %v5858_v43 = vld [vmem:[#allocation5 + $0x4ac] ss:$16 sps:$4 sm:$0xff]  }
  0xad   :  { %1931 = vmatpush1.bf16.msra.mxu0 %v5757_v44  ;;  %2383 = vmatpush1.bf16.msra.mxu1 %v5760_v45  ;;  %v5859_v44 = vld [vmem:[#allocation2 + $0xb4] ss:$28 sps:$4 sm:$0xff]  }
  0xae   :  { %1932 = vmatprep.subr.bf16.mxu0 %v5765_v46  ;;  %2384 = vmatprep.subr.bf16.mxu1 %v5768_v47  ;;  %v5853_v45 = vld [vmem:[#allocation5 + $0x4a0] ss:$16 sps:$4 sm:$0xff]   ;;  %v5856_v46 = vld [vmem:[#allocation5 + $0x4a8] ss:$16 sps:$4 sm:$0xff]   ;;  %v5864_v47 = vld [vmem:[#allocation5 + $0x4c4] ss:$16 sps:$4 sm:$0xff]  }
  0xaf   :  { %1883 = vmatprep.mubr.bf16.mxu0 %v5769_v48  ;;  %2335 = vmatprep.mubr.bf16.mxu1 %v5769_v48  ;;  %v5867_v48 = vld [vmem:[#allocation5 + $0x4cc] ss:$16 sps:$4 sm:$0xff]  }
  0xb1   :  { %1933 = vmatpush1.bf16.msra.mxu0 %v5763_v49  ;;  %2385 = vmatpush1.bf16.msra.mxu1 %v5766_v50  ;;  %v5861_v49 = vld [vmem:[#allocation2 + $0xb0] ss:$28 sps:$4 sm:$0xff]  }
  0xb2   :  { %1934 = vmatprep.subr.bf16.mxu0 %v5774_v51  ;;  %2386 = vmatprep.subr.bf16.mxu1 %v5777_v52  ;;  %v5862_v50 = vld [vmem:[#allocation5 + $0x4c0] ss:$16 sps:$4 sm:$0xff]   ;;  %v5865_v51 = vld [vmem:[#allocation5 + $0x4c8] ss:$16 sps:$4 sm:$0xff]   ;;  %v5870_v52 = vld [vmem:[#allocation5 + $0x4e4] ss:$16 sps:$4 sm:$0xff]  }
  0xb4   :  { %1884 = vmatmul.mubr.bf16.gmra.mrb[20].mxu0 %v5771_v53  ;;  %2336 = vmatmul.mubr.bf16.gmra.mrb[20].mxu1 %v5771_v53  ;;  %v5873_v53 = vld [vmem:[#allocation5 + $0x4ec] ss:$16 sps:$4 sm:$0xff]  }
  0xb5   :  { %1935 = vmatpush1.bf16.msra.mxu0 %v5772_v54  ;;  %2387 = vmatpush1.bf16.msra.mxu1 %v5775_v55  ;;  %v5874_v54 = vld [vmem:[#allocation2 + $0xec] ss:$28 sps:$4 sm:$0xff]   ;;  %v5868_v55 = vld [vmem:[#allocation5 + $0x4e0] ss:$16 sps:$4 sm:$0xff]  }
  0xb6   :  { %1936 = vmatprep.subr.bf16.mxu0 %v5780_v56  ;;  %2388 = vmatprep.subr.bf16.mxu1 %v5783_v57  ;;  %v5871_v56 = vld [vmem:[#allocation5 + $0x4e8] ss:$16 sps:$4 sm:$0xff]   ;;  %v5879_v57 = vld [vmem:[#allocation5 + $0x504] ss:$16 sps:$4 sm:$0xff]  }
  0xb7   :  { %1893 = vmatprep.mubr.bf16.mxu0 %v5784_v58  ;;  %2345 = vmatprep.mubr.bf16.mxu1 %v5784_v58  ;;  %v5882_v58 = vld [vmem:[#allocation5 + $0x50c] ss:$16 sps:$4 sm:$0xff]  }
  0xb9   :  { %1937 = vmatpush1.bf16.msra.mxu0 %v5778_v59  ;;  %2389 = vmatpush1.bf16.msra.mxu1 %v5781_v60  ;;  %v5876_v59 = vld [vmem:[#allocation2 + $0xe8] ss:$28 sps:$4 sm:$0xff]   ;;  %v5877_v60 = vld [vmem:[#allocation5 + $0x500] ss:$16 sps:$4 sm:$0xff]  }
  0xba   :  { %1938 = vmatprep.subr.bf16.mxu0 %v5789_v61  ;;  %2390 = vmatprep.subr.bf16.mxu1 %v5792_v62  ;;  %v5880_v61 = vld [vmem:[#allocation5 + $0x508] ss:$16 sps:$4 sm:$0xff]   ;;  %v5885_v62 = vld [vmem:[#allocation5 + $0x524] ss:$16 sps:$4 sm:$0xff]  }
  0xbc   :  { %1894 = vmatmul.mubr.bf16.gmra.mrb[24].mxu0 %v5786_v63  ;;  %2346 = vmatmul.mubr.bf16.gmra.mrb[24].mxu1 %v5786_v63  ;;  %v5888_v63 = vld [vmem:[#allocation5 + $0x52c] ss:$16 sps:$4 sm:$0xff]  }
  0xbd   :  { %1939 = vmatpush1.bf16.msra.mxu0 %v5787_v0  ;;  %2391 = vmatpush1.bf16.msra.mxu1 %v5790_v1  ;;  %v5889_v0 = vld [vmem:[#allocation2 + $0x124] ss:$28 sps:$4 sm:$0xff]  }
  0xbe   :  { %1940 = vmatprep.subr.bf16.mxu0 %v5795_v2  ;;  %2392 = vmatprep.subr.bf16.mxu1 %v5798_v3  ;;  %v5883_v1 = vld [vmem:[#allocation5 + $0x520] ss:$16 sps:$4 sm:$0xff]   ;;  %v5886_v2 = vld [vmem:[#allocation5 + $0x528] ss:$16 sps:$4 sm:$0xff]   ;;  %v5894_v3 = vld [vmem:[#allocation5 + $0x544] ss:$16 sps:$4 sm:$0xff]  }
  0xbf   :  { %1903 = vmatprep.mubr.bf16.mxu0 %v5799_v4  ;;  %2355 = vmatprep.mubr.bf16.mxu1 %v5799_v4  ;;  %v5897_v4 = vld [vmem:[#allocation5 + $0x54c] ss:$16 sps:$4 sm:$0xff]  }
  0xc1   :  { %1941 = vmatpush1.bf16.msra.mxu0 %v5793_v5  ;;  %2393 = vmatpush1.bf16.msra.mxu1 %v5796_v6  ;;  %v5891_v5 = vld [vmem:[#allocation2 + $0x120] ss:$28 sps:$4 sm:$0xff]  }
  0xc2   :  { %1942 = vmatprep.subr.bf16.mxu0 %v5804_v7  ;;  %2394 = vmatprep.subr.bf16.mxu1 %v5807_v8  ;;  %v5892_v6 = vld [vmem:[#allocation5 + $0x540] ss:$16 sps:$4 sm:$0xff]   ;;  %v5895_v7 = vld [vmem:[#allocation5 + $0x548] ss:$16 sps:$4 sm:$0xff]   ;;  %v5900_v8 = vld [vmem:[#allocation5 + $0x564] ss:$16 sps:$4 sm:$0xff]  }
  0xc4   :  { %1904 = vmatmul.mubr.bf16.gmra.mrb[28].mxu0 %v5801_v9  ;;  %2356 = vmatmul.mubr.bf16.gmra.mrb[28].mxu1 %v5801_v9  ;;  %v5903_v9 = vld [vmem:[#allocation5 + $0x56c] ss:$16 sps:$4 sm:$0xff]  }
  0xc5   :  { %1943 = vmatpush1.bf16.msra.mxu0 %v5802_v10  ;;  %2395 = vmatpush1.bf16.msra.mxu1 %v5805_v11  ;;  %v5904_v10 = vld [vmem:[#allocation2 + $0x15c] ss:$28 sps:$4 sm:$0xff]   ;;  %v5898_v11 = vld [vmem:[#allocation5 + $0x560] ss:$16 sps:$4 sm:$0xff]  }
  0xc6   :  { %1944 = vmatprep.subr.bf16.mxu0 %v5810_v12  ;;  %2396 = vmatprep.subr.bf16.mxu1 %v5813_v13  ;;  %v5901_v12 = vld [vmem:[#allocation5 + $0x568] ss:$16 sps:$4 sm:$0xff]   ;;  %v5909_v13 = vld [vmem:[#allocation5 + $0x584] ss:$16 sps:$4 sm:$0xff]  }
  0xc7   :  { %1946 = vmatprep.mubr.bf16.mxu0 %v5816_v14  ;;  %2398 = vmatprep.mubr.bf16.mxu1 %v5816_v14  ;;  %v5912_v14 = vld [vmem:[#allocation5 + $0x58c] ss:$16 sps:$4 sm:$0xff]  }
  0xc9   :  { %1945 = vmatpush1.bf16.msra.mxu0 %v5808_v15  ;;  %2397 = vmatpush1.bf16.msra.mxu1 %v5811_v16  ;;  %v5906_v15 = vld [vmem:[#allocation2 + $0x158] ss:$28 sps:$4 sm:$0xff]   ;;  %v5907_v16 = vld [vmem:[#allocation5 + $0x580] ss:$16 sps:$4 sm:$0xff]  }
  0xca   :  { %2027 = vmatprep.subr.bf16.mxu0 %v5819_v17  ;;  %2479 = vmatprep.subr.bf16.mxu1 %v5822_v18  ;;  %v5910_v17 = vld [vmem:[#allocation5 + $0x588] ss:$16 sps:$4 sm:$0xff]   ;;  %v5915_v18 = vld [vmem:[#allocation5 + $0x5a4] ss:$16 sps:$4 sm:$0xff]  }
  0xcc   :  { %1947 = vmatmul.mubr.bf16.vlgmr.msra.gmra.mrb[0].mxu0 %v5814_v19  ;;  %2399 = vmatmul.mubr.bf16.vlgmr.msra.gmra.mrb[0].mxu1 %v5814_v19  ;;  %v5918_v19 = vld [vmem:[#allocation5 + $0x5ac] ss:$16 sps:$4 sm:$0xff]  }
  0xcd   :  { %2028 = vmatpush1.bf16.msra.mxu0 %v5817_v20  ;;  %2480 = vmatpush1.bf16.msra.mxu1 %v5820_v21  ;;  %v5919_v20 = vld [vmem:[#allocation2 + $0x194] ss:$28 sps:$4 sm:$0xff]  }
  0xce   :  { %2029 = vmatprep.subr.bf16.mxu0 %v5825_v22  ;;  %2481 = vmatprep.subr.bf16.mxu1 %v5828_v23  ;;  %v5913_v21 = vld [vmem:[#allocation5 + $0x5a0] ss:$16 sps:$4 sm:$0xff]   ;;  %v5916_v22 = vld [vmem:[#allocation5 + $0x5a8] ss:$16 sps:$4 sm:$0xff]   ;;  %v5924_v23 = vld [vmem:[#allocation5 + $0x5c4] ss:$16 sps:$4 sm:$0xff]  }
  0xcf   :  { %1956 = vmatprep.mubr.bf16.mxu0 %v5829_v24  ;;  %2408 = vmatprep.mubr.bf16.mxu1 %v5829_v24  ;;  %v5921_v24 = vld [vmem:[#allocation2 + $0x190] ss:$28 sps:$4 sm:$0xff]  }
  0xd1   :  { %2030 = vmatpush1.bf16.msra.mxu0 %v5823_v25  ;;  %2482 = vmatpush1.bf16.msra.mxu1 %v5826_v26  ;;  %v5927_v25 = vld [vmem:[#allocation5 + $0x5cc] ss:$16 sps:$4 sm:$0xff]   ;;  %v5922_v26 = vld [vmem:[#allocation5 + $0x5c0] ss:$16 sps:$4 sm:$0xff]  }
  0xd2   :  { %2031 = vmatprep.subr.bf16.mxu0 %v5834_v27  ;;  %2483 = vmatprep.subr.bf16.mxu1 %v5837_v28  ;;  %v5925_v27 = vld [vmem:[#allocation5 + $0x5c8] ss:$16 sps:$4 sm:$0xff]   ;;  %v5930_v28 = vld [vmem:[#allocation5 + $0x5e4] ss:$16 sps:$4 sm:$0xff]  }
  0xd4   :  { %1957 = vmatmul.mubr.bf16.gmra.mrb[4].mxu0 %v5831_v29  ;;  %2409 = vmatmul.mubr.bf16.gmra.mrb[4].mxu1 %v5831_v29  ;;  %v5933_v29 = vld [vmem:[#allocation5 + $0x5ec] ss:$16 sps:$4 sm:$0xff]  }
  0xd5   :  { %2032 = vmatpush1.bf16.msra.mxu0 %v5832_v30  ;;  %2484 = vmatpush1.bf16.msra.mxu1 %v5835_v31  ;;  %v5928_v30 = vld [vmem:[#allocation5 + $0x5e0] ss:$16 sps:$4 sm:$0xff]  }
  0xd6   :  { %2033 = vmatprep.subr.bf16.mxu0 %v5840_v32  ;;  %2485 = vmatprep.subr.bf16.mxu1 %v5843_v33  ;;  %v5936_v31 = vld [vmem:[#allocation2 + $0x14] ss:$28 sps:$4 sm:$0xff]   ;;  %v5931_v32 = vld [vmem:[#allocation5 + $0x5e8] ss:$16 sps:$4 sm:$0xff]  }
  0xd7   :  { %1966 = vmatprep.mubr.bf16.mxu0 %v5844_v34  ;;  %2418 = vmatprep.mubr.bf16.mxu1 %v5844_v34  ;;  %v5939_v33 = vld [vmem:[#allocation5 + $0x604] ss:$16 sps:$4 sm:$0xff]   ;;  %v5966_v34 = vld [vmem:[#allocation5 + $0x60c] ss:$16 sps:$4 sm:$0xff]  }
  0xd9   :  { %2034 = vmatpush1.bf16.msra.mxu0 %v5838_v35  ;;  %2486 = vmatpush1.bf16.msra.mxu1 %v5841_v36  ;;  %v5934_v35 = vld [vmem:[#allocation2 + $0x10] ss:$28 sps:$4 sm:$0xff]  }
  0xda   :  { %2035 = vmatprep.subr.bf16.mxu0 %v5849_v37  ;;  %2487 = vmatprep.subr.bf16.mxu1 %v5852_v38  ;;  %v5937_v36 = vld [vmem:[#allocation5 + $0x600] ss:$16 sps:$4 sm:$0xff]   ;;  %v5940_v37 = vld [vmem:[#allocation2 + $0x4c] ss:$28 sps:$4 sm:$0xff]   ;;  %v5945_v38 = vld [vmem:[#allocation5 + $0x624] ss:$16 sps:$4 sm:$0xff]  }
  0xdc   :  { %1967 = vmatmul.mubr.bf16.gmra.mrb[8].mxu0 %v5846_v39  ;;  %2419 = vmatmul.mubr.bf16.gmra.mrb[8].mxu1 %v5846_v39  ;;  %v5964_v39 = vld [vmem:[#allocation5 + $0x608] ss:$16 sps:$4 sm:$0xff]  }
  0xdd   :  { %2036 = vmatpush1.bf16.msra.mxu0 %v5847_v40  ;;  %2488 = vmatpush1.bf16.msra.mxu1 %v5850_v41  ;;  %v5969_v40 = vld [vmem:[#allocation5 + $0x62c] ss:$16 sps:$4 sm:$0xff]   ;;  %v5943_v41 = vld [vmem:[#allocation5 + $0x620] ss:$16 sps:$4 sm:$0xff]  }
  0xde   :  { %2037 = vmatprep.subr.bf16.mxu0 %v5855_v42  ;;  %2489 = vmatprep.subr.bf16.mxu1 %v5858_v43  ;;  %v5951_v42 = vld [vmem:[#allocation5 + $0x644] ss:$16 sps:$4 sm:$0xff]   ;;  %v5967_v43 = vld [vmem:[#allocation5 + $0x628] ss:$16 sps:$4 sm:$0xff]  }
  0xdf   :  { %1976 = vmatprep.mubr.bf16.mxu0 %v5859_v44  ;;  %2428 = vmatprep.mubr.bf16.mxu1 %v5859_v44  ;;  %v5942_v44 = vld [vmem:[#allocation2 + $0x48] ss:$28 sps:$4 sm:$0xff]  }
  0xe1   :  { %2038 = vmatpush1.bf16.msra.mxu0 %v5853_v45  ;;  %2490 = vmatpush1.bf16.msra.mxu1 %v5856_v46  ;;  %v5946_v45 = vld [vmem:[#allocation2 + $0x84] ss:$28 sps:$4 sm:$0xff]  }
  0xe2   :  { %2039 = vmatprep.subr.bf16.mxu0 %v5864_v47  ;;  %2491 = vmatprep.subr.bf16.mxu1 %v5867_v48  ;;  %v5949_v46 = vld [vmem:[#allocation5 + $0x640] ss:$16 sps:$4 sm:$0xff]   ;;  %v5978_v47 = vld [vmem:[#allocation5 + $0x64c] ss:$16 sps:$4 sm:$0xff]   ;;  %v5957_v48 = vld [vmem:[#allocation5 + $0x664] ss:$16 sps:$4 sm:$0xff]  }
  0xe4   :  { %1977 = vmatmul.mubr.bf16.gmra.mrb[12].mxu0 %v5861_v49  ;;  %2429 = vmatmul.mubr.bf16.gmra.mrb[12].mxu1 %v5861_v49  ;;  %v5976_v49 = vld [vmem:[#allocation5 + $0x648] ss:$16 sps:$4 sm:$0xff]  }
  0xe5   :  { %2040 = vmatpush1.bf16.msra.mxu0 %v5862_v50  ;;  %2492 = vmatpush1.bf16.msra.mxu1 %v5865_v51  ;;  %v5981_v50 = vld [vmem:[#allocation5 + $0x66c] ss:$16 sps:$4 sm:$0xff]   ;;  %v5955_v51 = vld [vmem:[#allocation5 + $0x660] ss:$16 sps:$4 sm:$0xff]  }
  0xe6   :  { %2041 = vmatprep.subr.bf16.mxu0 %v5870_v52  ;;  %2493 = vmatprep.subr.bf16.mxu1 %v5873_v53  ;;  %v5963_v52 = vld [vmem:[#allocation5 + $0x684] ss:$16 sps:$4 sm:$0xff]   ;;  %v5979_v53 = vld [vmem:[#allocation5 + $0x668] ss:$16 sps:$4 sm:$0xff]  }
  0xe7   :  { %1986 = vmatprep.mubr.bf16.mxu0 %v5874_v54  ;;  %2438 = vmatprep.mubr.bf16.mxu1 %v5874_v54  ;;  %v5948_v54 = vld [vmem:[#allocation2 + $0x80] ss:$28 sps:$4 sm:$0xff]  }
  0xe9   :  { %2042 = vmatpush1.bf16.msra.mxu0 %v5868_v55  ;;  %2494 = vmatpush1.bf16.msra.mxu1 %v5871_v56  ;;  %v5952_v55 = vld [vmem:[#allocation2 + $0xbc] ss:$28 sps:$4 sm:$0xff]   ;;  %v5961_v56 = vld [vmem:[#allocation5 + $0x680] ss:$16 sps:$4 sm:$0xff]  }
  0xea   :  { %2043 = vmatprep.subr.bf16.mxu0 %v5879_v57  ;;  %2495 = vmatprep.subr.bf16.mxu1 %v5882_v58  ;;  %v5990_v57 = vld [vmem:[#allocation5 + $0x68c] ss:$16 sps:$4 sm:$0xff]   ;;  %v5975_v58 = vld [vmem:[#allocation5 + $0x6a4] ss:$16 sps:$4 sm:$0xff]  }
  0xec   :  { %1987 = vmatmul.mubr.bf16.gmra.mrb[16].mxu0 %v5876_v59  ;;  %2439 = vmatmul.mubr.bf16.gmra.mrb[16].mxu1 %v5876_v59  ;;  %v5988_v59 = vld [vmem:[#allocation5 + $0x688] ss:$16 sps:$4 sm:$0xff]  }
  0xed   :  { %2044 = vmatpush1.bf16.msra.mxu0 %v5877_v60  ;;  %2496 = vmatpush1.bf16.msra.mxu1 %v5880_v61  ;;  %v5993_v60 = vld [vmem:[#allocation5 + $0x6ac] ss:$16 sps:$4 sm:$0xff]   ;;  %v5973_v61 = vld [vmem:[#allocation5 + $0x6a0] ss:$16 sps:$4 sm:$0xff]  }
  0xee   :  { %2045 = vmatprep.subr.bf16.mxu0 %v5885_v62  ;;  %2497 = vmatprep.subr.bf16.mxu1 %v5888_v63  ;;  %v5987_v62 = vld [vmem:[#allocation5 + $0x6c4] ss:$16 sps:$4 sm:$0xff]   ;;  %v5991_v63 = vld [vmem:[#allocation5 + $0x6a8] ss:$16 sps:$4 sm:$0xff]  }
  0xef   :  { %1996 = vmatprep.mubr.bf16.mxu0 %v5889_v0  ;;  %2448 = vmatprep.mubr.bf16.mxu1 %v5889_v0  ;;  %v5954_v0 = vld [vmem:[#allocation2 + $0xb8] ss:$28 sps:$4 sm:$0xff]  }
  0xf1   :  { %2046 = vmatpush1.bf16.msra.mxu0 %v5883_v1  ;;  %2498 = vmatpush1.bf16.msra.mxu1 %v5886_v2  ;;  %v5958_v1 = vld [vmem:[#allocation2 + $0xf4] ss:$28 sps:$4 sm:$0xff]  }
  0xf2   :  { %2047 = vmatprep.subr.bf16.mxu0 %v5894_v3  ;;  %2499 = vmatprep.subr.bf16.mxu1 %v5897_v4  ;;  %v5985_v2 = vld [vmem:[#allocation5 + $0x6c0] ss:$16 sps:$4 sm:$0xff]   ;;  %v6002_v3 = vld [vmem:[#allocation5 + $0x6cc] ss:$16 sps:$4 sm:$0xff]   ;;  %v5999_v4 = vld [vmem:[#allocation5 + $0x6e4] ss:$16 sps:$4 sm:$0xff]  }
  0xf4   :  { %1997 = vmatmul.mubr.bf16.gmra.mrb[20].mxu0 %v5891_v5  ;;  %2449 = vmatmul.mubr.bf16.gmra.mrb[20].mxu1 %v5891_v5  ;;  %v6000_v5 = vld [vmem:[#allocation5 + $0x6c8] ss:$16 sps:$4 sm:$0xff]  }
  0xf5   :  { %2048 = vmatpush1.bf16.msra.mxu0 %v5892_v6  ;;  %2500 = vmatpush1.bf16.msra.mxu1 %v5895_v7  ;;  %v6005_v6 = vld [vmem:[#allocation5 + $0x6ec] ss:$16 sps:$4 sm:$0xff]   ;;  %v5997_v7 = vld [vmem:[#allocation5 + $0x6e0] ss:$16 sps:$4 sm:$0xff]  }
  0xf6   :  { %2049 = vmatprep.subr.bf16.mxu0 %v5900_v8  ;;  %2501 = vmatprep.subr.bf16.mxu1 %v5903_v9  ;;  %v6003_v8 = vld [vmem:[#allocation5 + $0x6e8] ss:$16 sps:$4 sm:$0xff]   ;;  %v6016_v9 = vld [vmem:[#allocation7 + $0x4] ss:$16 sps:$4 sm:$0xff]  }
  0xf7   :  { %2006 = vmatprep.mubr.bf16.mxu0 %v5904_v10  ;;  %2458 = vmatprep.mubr.bf16.mxu1 %v5904_v10  ;;  %v5960_v10 = vld [vmem:[#allocation2 + $0xf0] ss:$28 sps:$4 sm:$0xff]  }
  0xf9   :  { %2050 = vmatpush1.bf16.msra.mxu0 %v5898_v11  ;;  %2502 = vmatpush1.bf16.msra.mxu1 %v5901_v12  ;;  %v5970_v11 = vld [vmem:[#allocation2 + $0x12c] ss:$28 sps:$4 sm:$0xff]  }
  0xfa   :  { %2051 = vmatprep.subr.bf16.mxu0 %v5909_v13  ;;  %2503 = vmatprep.subr.bf16.mxu1 %v5912_v14  ;;  %v6019_v12 = vld [vmem:[#allocation7 + $0xc] ss:$16 sps:$4 sm:$0xff]   ;;  %v5972_v13 = vld [vmem:[#allocation2 + $0x128] ss:$28 sps:$4 sm:$0xff]  }
  0xfb   :  { %v5982_v14 = vld [vmem:[#allocation2 + $0x164] ss:$28 sps:$4 sm:$0xff]  }
  0xfc   :  { %2007 = vmatmul.mubr.bf16.gmra.mrb[24].mxu0 %v5906_v15  ;;  %2459 = vmatmul.mubr.bf16.gmra.mrb[24].mxu1 %v5906_v15  ;;  %v5984_v15 = vld [vmem:[#allocation2 + $0x160] ss:$28 sps:$4 sm:$0xff]  }
  0xfd   :  { %2052 = vmatpush1.bf16.msra.mxu0 %v5907_v16  ;;  %2504 = vmatpush1.bf16.msra.mxu1 %v5910_v17  ;;  %v5994_v16 = vld [vmem:[#allocation2 + $0x19c] ss:$28 sps:$4 sm:$0xff]  }
  0xfe   :  { %2053 = vmatprep.subr.bf16.mxu0 %v5915_v18  ;;  %2505 = vmatprep.subr.bf16.mxu1 %v5918_v19  ;;  %v5996_v17 = vld [vmem:[#allocation2 + $0x198] ss:$28 sps:$4 sm:$0xff]   ;;  %v6366_v18 = vmov 0  }
  0xff   :  { %2016 = vmatprep.mubr.bf16.mxu0 %v5919_v20  ;;  %2468 = vmatprep.mubr.bf16.mxu1 %v5919_v20  ;;  %v6006_v19 = vld [vmem:[#allocation2 + $0x18] ss:$28 sps:$4 sm:$0xff]   ;;  %v6014_v20 = vld [vmem:[#allocation7] ss:$16 sps:$4 sm:$0xff]  }
 0x101   :  { %2054 = vmatpush1.bf16.msra.mxu0 %v5913_v21  ;;  %2506 = vmatpush1.bf16.msra.mxu1 %v5916_v22  ;;  %v6017_v21 = vld [vmem:[#allocation7 + $0x8] ss:$16 sps:$4 sm:$0xff]   ;;  %v6022_v22 = vld [vmem:[#allocation7 + $0x24] ss:$16 sps:$4 sm:$0xff]  }
 0x102   :  { %2055 = vmatprep.subr.bf16.mxu0 %v5924_v23  ;;  %2507 = vmatprep.subr.bf16.mxu1 %v5927_v25  ;;  %v6025_v23 = vld [vmem:[#allocation7 + $0x2c] ss:$16 sps:$4 sm:$0xff]   ;;  %v6023_v25 = vld [vmem:[#allocation7 + $0x28] ss:$16 sps:$4 sm:$0xff]  }
 0x104   :  { %2017 = vmatmul.mubr.bf16.gmra.mrb[28].mxu0 %v5921_v24  ;;  %2469 = vmatmul.mubr.bf16.gmra.mrb[28].mxu1 %v5921_v24  ;;  %v6020_v24 = vld [vmem:[#allocation7 + $0x20] ss:$16 sps:$4 sm:$0xff]  }
 0x105   :  { %2056 = vmatpush1.bf16.msra.mxu0 %v5922_v26  ;;  %2508 = vmatpush1.bf16.msra.mxu1 %v5925_v27  ;;  %v6028_v26 = vld [vmem:[#allocation7 + $0x44] ss:$16 sps:$4 sm:$0xff]   ;;  %v6031_v27 = vld [vmem:[#allocation7 + $0x4c] ss:$16 sps:$4 sm:$0xff]  }
 0x106   :  { %2057 = vmatprep.subr.bf16.mxu0 %v5930_v28  ;;  %2509 = vmatprep.subr.bf16.mxu1 %v5933_v29  ;;  %v6007_v28 = vld [vmem:[#allocation2 + $0x50] ss:$28 sps:$4 sm:$0xff]  }
 0x107   :  { %2059 = vmatprep.mubr.bf16.mxu0 %v5936_v31  ;;  %2511 = vmatprep.mubr.bf16.mxu1 %v5936_v31  ;;  %v6026_v29 = vld [vmem:[#allocation7 + $0x40] ss:$16 sps:$4 sm:$0xff]   ;;  %v6034_v31 = vld [vmem:[#allocation7 + $0x64] ss:$16 sps:$4 sm:$0xff]  }
 0x109   :  { %2058 = vmatpush1.bf16.msra.mxu0 %v5928_v30  ;;  %2510 = vmatpush1.bf16.msra.mxu1 %v5931_v32  ;;  %v6029_v30 = vld [vmem:[#allocation7 + $0x48] ss:$16 sps:$4 sm:$0xff]   ;;  %v6037_v32 = vld [vmem:[#allocation7 + $0x6c] ss:$16 sps:$4 sm:$0xff]  }
 0x10a   :  { %2140 = vmatprep.subr.bf16.mxu0 %v5939_v33  ;;  %2592 = vmatprep.subr.bf16.mxu1 %v5966_v34  ;;  %v6032_v33 = vld [vmem:[#allocation7 + $0x60] ss:$16 sps:$4 sm:$0xff]   ;;  %v6035_v34 = vld [vmem:[#allocation7 + $0x68] ss:$16 sps:$4 sm:$0xff]  }
 0x10c   :  { %2060 = vmatmul.mubr.bf16.vlgmr.msra.gmra.mrb[0].mxu0 %v5934_v35  ;;  %2512 = vmatmul.mubr.bf16.vlgmr.msra.gmra.mrb[0].mxu1 %v5934_v35  ;;  %v6040_v35 = vld [vmem:[#allocation7 + $0x84] ss:$16 sps:$4 sm:$0xff]  }
 0x10d   :  { %2141 = vmatpush1.bf16.msra.mxu0 %v5937_v36  ;;  %2069 = vmatprep.mubr.bf16.mxu0 %v5940_v37  ;;  %v6043_v36 = vld [vmem:[#allocation7 + $0x8c] ss:$16 sps:$4 sm:$0xff]  }
 0x10e   :  { %2521 = vmatprep.mubr.bf16.mxu1 %v5940_v37  ;;  %2142 = vmatprep.subr.bf16.mxu0 %v5945_v38  ;;  %v6008_v37 = vld [vmem:[#allocation2 + $0x88] ss:$28 sps:$4 sm:$0xff]   ;;  %v6038_v38 = vld [vmem:[#allocation7 + $0x80] ss:$16 sps:$4 sm:$0xff]  }
 0x10f   :  { %2593 = vmatpush1.bf16.msra.mxu1 %v5964_v39  ;;  %v6041_v39 = vld [vmem:[#allocation7 + $0x88] ss:$16 sps:$4 sm:$0xff]  }
 0x110   :  { %2594 = vmatprep.subr.bf16.mxu1 %v5969_v40  ;;  %v6046_v40 = vld [vmem:[#allocation7 + $0xa4] ss:$16 sps:$4 sm:$0xff]  }
 0x111   :  { %2143 = vmatpush1.bf16.msra.mxu0 %v5943_v41  ;;  %v6049_v41 = vld [vmem:[#allocation7 + $0xac] ss:$16 sps:$4 sm:$0xff]  }
 0x112   :  { %2144 = vmatprep.subr.bf16.mxu0 %v5951_v42  ;;  %v6044_v42 = vld [vmem:[#allocation7 + $0xa0] ss:$16 sps:$4 sm:$0xff]  }
 0x113   :  { %2595 = vmatpush1.bf16.msra.mxu1 %v5967_v43  ;;  %v6047_v43 = vld [vmem:[#allocation7 + $0xa8] ss:$16 sps:$4 sm:$0xff]  }
 0x114   :  { %2070 = vmatmul.mubr.bf16.gmra.mrb[4].mxu0 %v5942_v44  ;;  %2522 = vmatmul.mubr.bf16.gmra.mrb[4].mxu1 %v5942_v44  ;;  %v6052_v44 = vld [vmem:[#allocation7 + $0xc4] ss:$16 sps:$4 sm:$0xff]  }
 0x115   :  { %2079 = vmatprep.mubr.bf16.mxu0 %v5946_v45  ;;  %2531 = vmatprep.mubr.bf16.mxu1 %v5946_v45  ;;  %v6055_v45 = vld [vmem:[#allocation7 + $0xcc] ss:$16 sps:$4 sm:$0xff]  }
 0x116   :  { %2145 = vmatpush1.bf16.msra.mxu0 %v5949_v46  ;;  %2596 = vmatprep.subr.bf16.mxu1 %v5978_v47  ;;  %v6009_v46 = vld [vmem:[#allocation2 + $0xc0] ss:$28 sps:$4 sm:$0xff]  }
 0x117   :  { %2146 = vmatprep.subr.bf16.mxu0 %v5957_v48  ;;  %2597 = vmatpush1.bf16.msra.mxu1 %v5976_v49  ;;  %v6050_v47 = vld [vmem:[#allocation7 + $0xc0] ss:$16 sps:$4 sm:$0xff]   ;;  %v6053_v48 = vld [vmem:[#allocation7 + $0xc8] ss:$16 sps:$4 sm:$0xff]   ;;  %v6058_v49 = vld [vmem:[#allocation7 + $0xe4] ss:$16 sps:$4 sm:$0xff]  }
 0x118   :  { %2598 = vmatprep.subr.bf16.mxu1 %v5981_v50  ;;  %v6061_v50 = vld [vmem:[#allocation7 + $0xec] ss:$16 sps:$4 sm:$0xff]  }
 0x11a   :  { %2147 = vmatpush1.bf16.msra.mxu0 %v5955_v51  ;;  %v6056_v51 = vld [vmem:[#allocation7 + $0xe0] ss:$16 sps:$4 sm:$0xff]  }
 0x11b   :  { %2148 = vmatprep.subr.bf16.mxu0 %v5963_v52  ;;  %2599 = vmatpush1.bf16.msra.mxu1 %v5979_v53  ;;  %v6059_v52 = vld [vmem:[#allocation7 + $0xe8] ss:$16 sps:$4 sm:$0xff]   ;;  %v6064_v53 = vld [vmem:[#allocation7 + $0x104] ss:$16 sps:$4 sm:$0xff]  }
 0x11c   :  { %2080 = vmatmul.mubr.bf16.gmra.mrb[8].mxu0 %v5948_v54  ;;  %2532 = vmatmul.mubr.bf16.gmra.mrb[8].mxu1 %v5948_v54  ;;  %v6067_v54 = vld [vmem:[#allocation7 + $0x10c] ss:$16 sps:$4 sm:$0xff]  }
 0x11d   :  { %2089 = vmatprep.mubr.bf16.mxu0 %v5952_v55  ;;  %2541 = vmatprep.mubr.bf16.mxu1 %v5952_v55  ;;  %v6010_v55 = vld [vmem:[#allocation2 + $0xf8] ss:$28 sps:$4 sm:$0xff]  }
 0x11e   :  { %2149 = vmatpush1.bf16.msra.mxu0 %v5961_v56  ;;  %2600 = vmatprep.subr.bf16.mxu1 %v5990_v57  ;;  %v6062_v56 = vld [vmem:[#allocation7 + $0x100] ss:$16 sps:$4 sm:$0xff]   ;;  %v6065_v57 = vld [vmem:[#allocation7 + $0x108] ss:$16 sps:$4 sm:$0xff]  }
 0x11f   :  { %2150 = vmatprep.subr.bf16.mxu0 %v5975_v58  ;;  %2601 = vmatpush1.bf16.msra.mxu1 %v5988_v59  ;;  %v6070_v58 = vld [vmem:[#allocation7 + $0x124] ss:$16 sps:$4 sm:$0xff]   ;;  %v6073_v59 = vld [vmem:[#allocation7 + $0x12c] ss:$16 sps:$4 sm:$0xff]  }
 0x120   :  { %2602 = vmatprep.subr.bf16.mxu1 %v5993_v60  ;;  %v6068_v60 = vld [vmem:[#allocation7 + $0x120] ss:$16 sps:$4 sm:$0xff]  }
 0x122   :  { %2151 = vmatpush1.bf16.msra.mxu0 %v5973_v61  ;;  %v6071_v61 = vld [vmem:[#allocation7 + $0x128] ss:$16 sps:$4 sm:$0xff]  }
 0x123   :  { %2152 = vmatprep.subr.bf16.mxu0 %v5987_v62  ;;  %2603 = vmatpush1.bf16.msra.mxu1 %v5991_v63  ;;  %v6076_v62 = vld [vmem:[#allocation7 + $0x144] ss:$16 sps:$4 sm:$0xff]   ;;  %v6079_v63 = vld [vmem:[#allocation7 + $0x14c] ss:$16 sps:$4 sm:$0xff]  }
 0x124   :  { %2090 = vmatmul.mubr.bf16.gmra.mrb[12].mxu0 %v5954_v0  ;;  %2542 = vmatmul.mubr.bf16.gmra.mrb[12].mxu1 %v5954_v0  ;;  %v6011_v0 = vld [vmem:[#allocation2 + $0x130] ss:$28 sps:$4 sm:$0xff]  }
 0x125   :  { %2099 = vmatprep.mubr.bf16.mxu0 %v5958_v1  ;;  %2551 = vmatprep.mubr.bf16.mxu1 %v5958_v1  ;;  %v6074_v1 = vld [vmem:[#allocation7 + $0x140] ss:$16 sps:$4 sm:$0xff]  }
 0x126   :  { %2153 = vmatpush1.bf16.msra.mxu0 %v5985_v2  ;;  %2604 = vmatprep.subr.bf16.mxu1 %v6002_v3  ;;  %v6077_v2 = vld [vmem:[#allocation7 + $0x148] ss:$16 sps:$4 sm:$0xff]   ;;  %v6082_v3 = vld [vmem:[#allocation7 + $0x164] ss:$16 sps:$4 sm:$0xff]  }
 0x127   :  { %2154 = vmatprep.subr.bf16.mxu0 %v5999_v4  ;;  %2605 = vmatpush1.bf16.msra.mxu1 %v6000_v5  ;;  %v6085_v4 = vld [vmem:[#allocation7 + $0x16c] ss:$16 sps:$4 sm:$0xff]   ;;  %v6080_v5 = vld [vmem:[#allocation7 + $0x160] ss:$16 sps:$4 sm:$0xff]  }
 0x128   :  { %2606 = vmatprep.subr.bf16.mxu1 %v6005_v6  ;;  %v6083_v6 = vld [vmem:[#allocation7 + $0x168] ss:$16 sps:$4 sm:$0xff]  }
 0x12a   :  { %2155 = vmatpush1.bf16.msra.mxu0 %v5997_v7  ;;  %v6088_v7 = vld [vmem:[#allocation7 + $0x184] ss:$16 sps:$4 sm:$0xff]  }
 0x12b   :  { %2607 = vmatpush1.bf16.msra.mxu1 %v6003_v8  ;;  %3591 = vmatprep.subr.bf16.mxu0 %v6016_v9  ;;  %v6091_v8 = vld [vmem:[#allocation7 + $0x18c] ss:$16 sps:$4 sm:$0xff]   ;;  %v6012_v9 = vld [vmem:[#allocation2 + $0x168] ss:$28 sps:$4 sm:$0xff]  }
 0x12c   :  { %2100 = vmatmul.mubr.bf16.gmra.mrb[16].mxu0 %v5960_v10  ;;  %2552 = vmatmul.mubr.bf16.gmra.mrb[16].mxu1 %v5960_v10  ;;  %v6086_v10 = vld [vmem:[#allocation7 + $0x180] ss:$16 sps:$4 sm:$0xff]  }
 0x12d   :  { %2109 = vmatprep.mubr.bf16.mxu0 %v5970_v11  ;;  %2561 = vmatprep.mubr.bf16.mxu1 %v5970_v11  ;;  %v6089_v11 = vld [vmem:[#allocation7 + $0x188] ss:$16 sps:$4 sm:$0xff]  }
 0x12e   :  { %3817 = vmatprep.subr.bf16.mxu1 %v6019_v12  ;;  %v6094_v12 = vld [vmem:[#allocation7 + $0x1a4] ss:$16 sps:$4 sm:$0xff]  }
 0x134   :  { %2110 = vmatmul.mubr.bf16.gmra.mrb[20].mxu0 %v5972_v13  ;;  %2562 = vmatmul.mubr.bf16.gmra.mrb[20].mxu1 %v5972_v13  ;;  %v6097_v13 = vld [vmem:[#allocation7 + $0x1ac] ss:$16 sps:$4 sm:$0xff]  }
 0x135   :  { %2119 = vmatprep.mubr.bf16.mxu0 %v5982_v14  ;;  %2571 = vmatprep.mubr.bf16.mxu1 %v5982_v14  ;;  %v6092_v14 = vld [vmem:[#allocation7 + $0x1a0] ss:$16 sps:$4 sm:$0xff]  }
 0x13c   :  { %2120 = vmatmul.mubr.bf16.gmra.mrb[24].mxu0 %v5984_v15  ;;  %2572 = vmatmul.mubr.bf16.gmra.mrb[24].mxu1 %v5984_v15  ;;  %v6095_v15 = vld [vmem:[#allocation7 + $0x1a8] ss:$16 sps:$4 sm:$0xff]  }
 0x13d   :  { %2129 = vmatprep.mubr.bf16.mxu0 %v5994_v16  ;;  %2581 = vmatprep.mubr.bf16.mxu1 %v5994_v16  ;;  %v6013_v16 = vld [vmem:[#allocation2 + $0x1a0] ss:$28 sps:$4 sm:$0xff]  }
 0x144   :  { %2130 = vmatmul.mubr.bf16.gmra.mrb[28].mxu0 %v5996_v17  ;;  %2582 = vmatmul.mubr.bf16.gmra.mrb[28].mxu1 %v5996_v17  ;;  %v6100_v17 = vld [vmem:[#allocation7 + $0x1c4] ss:$16 sps:$4 sm:$0xff]  }
 0x145   :  { %2172 = vmatprep.mubr.bf16.mxu0 %v6366_v18  ;;  %2624 = vmatprep.mubr.bf16.mxu1 %v6366_v18 }
 0x14c   :  { %2173 = vmatmul.mubr.bf16.vlgmr.msra.gmra.mrb[0].mxu0 %v6006_v19  ;;  %2625 = vmatmul.mubr.bf16.vlgmr.msra.gmra.mrb[0].mxu1 %v6006_v19  ;;  %v6103_v19 = vld [vmem:[#allocation7 + $0x1cc] ss:$16 sps:$4 sm:$0xff]  }
 0x14d   :  { %2182 = vmatprep.mubr.bf16.mxu0 %v6366_v18  ;;  %2634 = vmatprep.mubr.bf16.mxu1 %v6366_v18 }
 0x14e   :  { %3592 = vmatpush1.bf16.msra.mxu0 %v6014_v20  ;;  %3818 = vmatpush1.bf16.msra.mxu1 %v6017_v21  ;;  %v6098_v20 = vld [vmem:[#allocation7 + $0x1c0] ss:$16 sps:$4 sm:$0xff]   ;;  %v6101_v21 = vld [vmem:[#allocation7 + $0x1c8] ss:$16 sps:$4 sm:$0xff]  }
 0x14f   :  { %3593 = vmatprep.subr.bf16.mxu0 %v6022_v22  ;;  %3819 = vmatprep.subr.bf16.mxu1 %v6025_v23  ;;  %v6109_v22 = vld [vmem:[#allocation7 + $0x1ec] ss:$16 sps:$4 sm:$0xff]   ;;  %v6104_v23 = vld [vmem:[#allocation7 + $0x1e0] ss:$16 sps:$4 sm:$0xff]  }
 0x152   :  { %3594 = vmatpush1.bf16.msra.mxu0 %v6020_v24  ;;  %3820 = vmatpush1.bf16.msra.mxu1 %v6023_v25  ;;  %v6107_v24 = vld [vmem:[#allocation7 + $0x1e8] ss:$16 sps:$4 sm:$0xff]   ;;  %v6112_v25 = vld [vmem:[#allocation7 + $0x204] ss:$16 sps:$4 sm:$0xff]  }
 0x153   :  { %3595 = vmatprep.subr.bf16.mxu0 %v6028_v26  ;;  %3821 = vmatprep.subr.bf16.mxu1 %v6031_v27  ;;  %v6115_v26 = vld [vmem:[#allocation7 + $0x20c] ss:$16 sps:$4 sm:$0xff]   ;;  %v373_v27 = vlaneseq }
 0x154   :  { %2183 = vmatmul.mubr.bf16.gmra.mrb[4].mxu0 %v6007_v28  ;;  %2635 = vmatmul.mubr.bf16.gmra.mrb[4].mxu1 %v6007_v28 }
 0x155   :  { %2192 = vmatprep.mubr.bf16.mxu0 %v6366_v18  ;;  %2644 = vmatprep.mubr.bf16.mxu1 %v6366_v18  ;;  %v6487_v28 = vshrl.u32 %v373_v27, 7 }
 0x156   :  { %3596 = vmatpush1.bf16.msra.mxu0 %v6026_v29  ;;  %3822 = vmatpush1.bf16.msra.mxu1 %v6029_v30 }
 0x157   :  { %3597 = vmatprep.subr.bf16.mxu0 %v6034_v31  ;;  %3823 = vmatprep.subr.bf16.mxu1 %v6037_v32  ;;  %v375_v29 = vsub.s32 0, %v6487_v28  ;;  %v383_v30 = vsub.s32 2, %v6487_v28  ;;  %v371_v31 = vld [vmem:[%s6758_s2] sm:$0xf]  ;;  %v379_v32 = vsub.s32 1, %v6487_v28 }
 0x15a   :  { %3598 = vmatpush1.bf16.msra.mxu0 %v6032_v33  ;;  %3824 = vmatpush1.bf16.msra.mxu1 %v6035_v34  ;;  %v387_v33 = vsub.s32 3, %v6487_v28  ;;  %v6498_v34 = vrot.slane %v371_v31, %v375_v29 }
 0x15b   :  { %3599 = vmatprep.subr.bf16.mxu0 %v6040_v35  ;;  %3825 = vmatprep.subr.bf16.mxu1 %v6043_v36  ;;  %v6502_v35 = vrot.slane %v371_v31, %v383_v30  ;;  %v6506_v36 = vrot.slane %v371_v31, %v379_v32 }
 0x15c   :  { %2193 = vmatmul.mubr.bf16.gmra.mrb[8].mxu0 %v6008_v37  ;;  %2645 = vmatmul.mubr.bf16.gmra.mrb[8].mxu1 %v6008_v37  ;;  %v6510_v37 = vrot.slane %v371_v31, %v387_v33 }
 0x15d   :  { %2202 = vmatprep.mubr.bf16.mxu0 %v6366_v18  ;;  %2654 = vmatprep.mubr.bf16.mxu1 %v6366_v18 }
 0x15e   :  { %3600 = vmatpush1.bf16.msra.mxu0 %v6038_v38  ;;  %3826 = vmatpush1.bf16.msra.mxu1 %v6041_v39 }
 0x15f   :  { %3601 = vmatprep.subr.bf16.mxu0 %v6046_v40  ;;  %3827 = vmatprep.subr.bf16.mxu1 %v6049_v41 }
 0x162   :  { %3602 = vmatpush1.bf16.msra.mxu0 %v6044_v42  ;;  %3828 = vmatpush1.bf16.msra.mxu1 %v6047_v43 }
 0x163   :  { %3603 = vmatprep.subr.bf16.mxu0 %v6052_v44  ;;  %3829 = vmatprep.subr.bf16.mxu1 %v6055_v45 }
 0x164   :  { %2203 = vmatmul.mubr.bf16.gmra.mrb[12].mxu0 %v6009_v46  ;;  %2655 = vmatmul.mubr.bf16.gmra.mrb[12].mxu1 %v6009_v46 }
 0x165   :  { %2212 = vmatprep.mubr.bf16.mxu0 %v6366_v18  ;;  %2664 = vmatprep.mubr.bf16.mxu1 %v6366_v18 }
 0x166   :  { %3604 = vmatpush1.bf16.msra.mxu0 %v6050_v47  ;;  %3830 = vmatpush1.bf16.msra.mxu1 %v6053_v48 }
 0x167   :  { %3605 = vmatprep.subr.bf16.mxu0 %v6058_v49  ;;  %3831 = vmatprep.subr.bf16.mxu1 %v6061_v50 }
 0x16a   :  { %3606 = vmatpush1.bf16.msra.mxu0 %v6056_v51  ;;  %3832 = vmatpush1.bf16.msra.mxu1 %v6059_v52 }
 0x16b   :  { %3607 = vmatprep.subr.bf16.mxu0 %v6064_v53  ;;  %3833 = vmatprep.subr.bf16.mxu1 %v6067_v54 }
 0x16c   :  { %2213 = vmatmul.mubr.bf16.gmra.mrb[16].mxu0 %v6010_v55  ;;  %2665 = vmatmul.mubr.bf16.gmra.mrb[16].mxu1 %v6010_v55 }
 0x16d   :  { %2222 = vmatprep.mubr.bf16.mxu0 %v6366_v18  ;;  %2674 = vmatprep.mubr.bf16.mxu1 %v6366_v18 }
 0x16e   :  { %3608 = vmatpush1.bf16.msra.mxu0 %v6062_v56  ;;  %3834 = vmatpush1.bf16.msra.mxu1 %v6065_v57 }
 0x16f   :  { %3609 = vmatprep.subr.bf16.mxu0 %v6070_v58  ;;  %3835 = vmatprep.subr.bf16.mxu1 %v6073_v59 }
 0x172   :  { %3610 = vmatpush1.bf16.msra.mxu0 %v6068_v60  ;;  %3836 = vmatpush1.bf16.msra.mxu1 %v6071_v61 }
 0x173   :  { %3611 = vmatprep.subr.bf16.mxu0 %v6076_v62  ;;  %3837 = vmatprep.subr.bf16.mxu1 %v6079_v63 }
 0x174   :  { %2223 = vmatmul.mubr.bf16.gmra.mrb[20].mxu0 %v6011_v0  ;;  %2675 = vmatmul.mubr.bf16.gmra.mrb[20].mxu1 %v6011_v0 }
 0x175   :  { %2232 = vmatprep.mubr.bf16.mxu0 %v6366_v18  ;;  %2684 = vmatprep.mubr.bf16.mxu1 %v6366_v18 }
 0x176   :  { %3612 = vmatpush1.bf16.msra.mxu0 %v6074_v1  ;;  %3838 = vmatpush1.bf16.msra.mxu1 %v6077_v2 }
 0x177   :  { %3613 = vmatprep.subr.bf16.mxu0 %v6082_v3  ;;  %3839 = vmatprep.subr.bf16.mxu1 %v6085_v4  ;;  %v6110_v4 = vld [vmem:[#allocation7 + $0x200] ss:$16 sps:$4 sm:$0xff]  }
 0x17a   :  { %3614 = vmatpush1.bf16.msra.mxu0 %v6080_v5  ;;  %3840 = vmatpush1.bf16.msra.mxu1 %v6083_v6  ;;  %v6113_v5 = vld [vmem:[#allocation7 + $0x208] ss:$16 sps:$4 sm:$0xff]  }
 0x17b   :  { %3615 = vmatprep.subr.bf16.mxu0 %v6088_v7  ;;  %3841 = vmatprep.subr.bf16.mxu1 %v6091_v8 }
 0x17c   :  { %2233 = vmatmul.mubr.bf16.gmra.mrb[24].mxu0 %v6012_v9  ;;  %2685 = vmatmul.mubr.bf16.gmra.mrb[24].mxu1 %v6012_v9 }
 0x17d   :  { %2242 = vmatprep.mubr.bf16.mxu0 %v6366_v18  ;;  %2694 = vmatprep.mubr.bf16.mxu1 %v6366_v18  ;;  %v6106_v18 = vld [vmem:[#allocation7 + $0x1e4] ss:$16 sps:$4 sm:$0xff]  }
 0x17e   :  { %3616 = vmatpush1.bf16.msra.mxu0 %v6086_v10  ;;  %3842 = vmatpush1.bf16.msra.mxu1 %v6089_v11  ;;  %v6118_v10 = vld [vmem:[#allocation7 + $0x224] ss:$16 sps:$4 sm:$0xff]   ;;  %v6121_v11 = vld [vmem:[#allocation7 + $0x22c] ss:$16 sps:$4 sm:$0xff]  }
 0x17f   :  { %3617 = vmatprep.subr.bf16.mxu0 %v6094_v12  ;;  %3843 = vmatprep.subr.bf16.mxu1 %v6097_v13 }
 0x182   :  { %3618 = vmatpush1.bf16.msra.mxu0 %v6092_v14  ;;  %3844 = vmatpush1.bf16.msra.mxu1 %v6095_v15 }
 0x183   :  { %3619 = vmatprep.subr.bf16.mxu0 %v6100_v17  ;;  %3845 = vmatprep.subr.bf16.mxu1 %v6103_v19 }
 0x184   :  { %2243 = vmatmul.mubr.bf16.gmra.mrb[28].mxu0 %v6013_v16  ;;  %2695 = vmatmul.mubr.bf16.gmra.mrb[28].mxu1 %v6013_v16 }
 0x186   :  { %3620 = vmatpush1.bf16.msra.mxu0 %v6098_v20  ;;  %3846 = vmatpush1.bf16.msra.mxu1 %v6101_v21 }
 0x187   :  { %3621 = vmatprep.subr.bf16.mxu0 %v6106_v18  ;;  %3847 = vmatprep.subr.bf16.mxu1 %v6109_v22  ;;  %v6116_v22 = vld [vmem:[#allocation7 + $0x220] ss:$16 sps:$4 sm:$0xff]  }
 0x18a   :  { %3622 = vmatpush1.bf16.msra.mxu0 %v6104_v23  ;;  %3848 = vmatpush1.bf16.msra.mxu1 %v6107_v24  ;;  %v6119_v23 = vld [vmem:[#allocation7 + $0x228] ss:$16 sps:$4 sm:$0xff]   ;;  %v6124_v24 = vld [vmem:[#allocation7 + $0x244] ss:$16 sps:$4 sm:$0xff]  }
 0x18b   :  { %3704 = vmatprep.subr.bf16.mxu0 %v6112_v25  ;;  %3930 = vmatprep.subr.bf16.mxu1 %v6115_v26 }
 0x21f   :  { %v2174_v38 = vpop.f32.mrb[0].mxu0  ;;  %v2626_v39 = vpop.f32.mrb[0].mxu1 }
 0x220   :  { %v5200_v40 = vadd.f32 %v2174_v38, %v6498_v34  ;;  %v5232_v41 = vadd.f32 %v2626_v39, %v6502_v35  ;;  %v2176_v42 = vpop.f32.mrb[1].mxu0  ;;  %v2628_v43 = vpop.f32.mrb[1].mxu1  ;;  %v6127_v38 = vld [vmem:[#allocation7 + $0x24c] ss:$16 sps:$4 sm:$0xff]  }
 0x221   :  { %v5201_v44 = vadd.f32 %v2176_v42, %v6506_v36  ;;  %v5233_v45 = vadd.f32 %v2628_v43, %v6510_v37  ;;  %v2178_v46 = vpop.f32.mrb[2].mxu0  ;;  %v2630_v47 = vpop.f32.mrb[2].mxu1 }
 0x222   :  { %v5202_v48 = vadd.f32 %v2178_v46, %v6498_v34  ;;  %v5234_v49 = vadd.f32 %v2630_v47, %v6502_v35  ;;  %v2180_v50 = vpop.f32.mrb[3].mxu0  ;;  %v2632_v51 = vpop.f32.mrb[3].mxu1  ;;  %v2705_v54 = vmax.f32 %v5200_v40, 0.0  ;;  %v2707_v55 = vmax.f32 %v5232_v41, 0.0 }
 0x223   :  { %v5203_v52 = vadd.f32 %v2180_v50, %v6506_v36  ;;  %v5235_v53 = vadd.f32 %v2632_v51, %v6510_v37  ;;  %v2706_v58 = vmax.f32 %v5201_v44, 0.0  ;;  %v2708_v59 = vmax.f32 %v5233_v45, 0.0  ;;  %v6125_v50 = vld [vmem:[#allocation7 + $0x248] ss:$16 sps:$4 sm:$0xff]  }
 0x224   :  { %v2709_v56 = vmax.f32 %v5202_v48, 0.0  ;;  %v2711_v57 = vmax.f32 %v5234_v49, 0.0  ;;  %v6122_v49 = vld [vmem:[#allocation7 + $0x240] ss:$16 sps:$4 sm:$0xff]  }
 0x225   :  { %v2710_v60 = vmax.f32 %v5203_v52, 0.0  ;;  %v2712_v61 = vmax.f32 %v5235_v53, 0.0 }
 0x226   :  { %v2769_v62 = vpack.c.bf16 %v2709_v56, %v2705_v54  ;;  %v6520_v63 = vpack.c.bf16 %v2711_v57, %v2707_v55  ;;  %v6130_v55 = vld [vmem:[#allocation7 + $0x264] ss:$16 sps:$4 sm:$0xff]   ;;  %v6133_v56 = vld [vmem:[#allocation7 + $0x26c] ss:$16 sps:$4 sm:$0xff]  }
 0x227   :  { %v2770_v0 = vpack.c.bf16 %v2710_v60, %v2706_v58  ;;  %v6522_v1 = vpack.c.bf16 %v2712_v61, %v2708_v59  ;;  %v2184_v2 = vpop.f32.mrb[4].mxu0  ;;  %v2636_v3 = vpop.f32.mrb[4].mxu1 }
 0x228   :  { %v5204_v6 = vadd.f32 %v2184_v2, %v6498_v34  ;;  %v5236_v7 = vadd.f32 %v2636_v3, %v6502_v35  ;;  %v2186_v8 = vpop.f32.mrb[5].mxu0  ;;  %v2638_v9 = vpop.f32.mrb[5].mxu1 }
 0x229   :  { %v5205_v12 = vadd.f32 %v2186_v8, %v6506_v36  ;;  %v5237_v13 = vadd.f32 %v2638_v9, %v6510_v37  ;;  %v2188_v14 = vpop.f32.mrb[6].mxu0  ;;  %v2640_v15 = vpop.f32.mrb[6].mxu1  ;;  %3623 = vmatprep.mubr.bf16.mxu0 %v2770_v0  ;;  %3849 = vmatprep.mubr.bf16.mxu1 %v2770_v0 }
 0x22a   :  { %v5206_v16 = vadd.f32 %v2188_v14, %v6498_v34  ;;  %v5238_v17 = vadd.f32 %v2640_v15, %v6502_v35  ;;  %v2190_v19 = vpop.f32.mrb[7].mxu0  ;;  %v2642_v20 = vpop.f32.mrb[7].mxu1  ;;  %3624 = vmatmul.mubr.bf16.vlgmr.msra.gmra.mrb[32].mxu0 %v2769_v62  ;;  %3850 = vmatmul.mubr.bf16.vlgmr.msra.gmra.mrb[32].mxu1 %v2769_v62  ;;  %v2713_v25 = vmax.f32 %v5204_v6, 0.0  ;;  %v2715_v26 = vmax.f32 %v5236_v7, 0.0  ;;  %v6131_v6 = vld [vmem:[#allocation7 + $0x268] ss:$16 sps:$4 sm:$0xff]  }
 0x22b   :  { %v5207_v21 = vadd.f32 %v2190_v19, %v6506_v36  ;;  %v5239_v18 = vadd.f32 %v2642_v20, %v6510_v37  ;;  %3705 = vmatpush1.bf16.msra.mxu0 %v6110_v4  ;;  %3931 = vmatpush1.bf16.msra.mxu1 %v6113_v5  ;;  %v2714_v39 = vmax.f32 %v5205_v12, 0.0  ;;  %v2716_v40 = vmax.f32 %v5237_v13, 0.0  ;;  %v6128_v5 = vld [vmem:[#allocation7 + $0x260] ss:$16 sps:$4 sm:$0xff]   ;;  %v6136_v7 = vld [vmem:[#allocation7 + $0x284] ss:$16 sps:$4 sm:$0xff]  }
 0x22c   :  { %v2717_v27 = vmax.f32 %v5206_v16, 0.0  ;;  %v2719_v31 = vmax.f32 %v5238_v17, 0.0  ;;  %3706 = vmatprep.subr.bf16.mxu0 %v6118_v10  ;;  %3932 = vmatprep.subr.bf16.mxu1 %v6121_v11  ;;  %v6139_v12 = vld [vmem:[#allocation7 + $0x28c] ss:$16 sps:$4 sm:$0xff]  }
 0x22d   :  { %v2718_v41 = vmax.f32 %v5207_v21, 0.0  ;;  %v2720_v42 = vmax.f32 %v5239_v18, 0.0 }
 0x22e   :  { %v2773_v43 = vpack.c.bf16 %v2717_v27, %v2713_v25  ;;  %v6532_v44 = vpack.c.bf16 %v2719_v31, %v2715_v26 }
 0x22f   :  { %v2774_v45 = vpack.c.bf16 %v2718_v41, %v2714_v39  ;;  %v6534_v46 = vpack.c.bf16 %v2720_v42, %v2716_v40  ;;  %v2194_v47 = vpop.f32.mrb[8].mxu0  ;;  %v2646_v48 = vpop.f32.mrb[8].mxu1  ;;  %3707 = vmatpush1.bf16.msra.mxu0 %v6116_v22  ;;  %3933 = vmatpush1.bf16.msra.mxu1 %v6119_v23  ;;  %v6134_v23 = vld [vmem:[#allocation7 + $0x280] ss:$16 sps:$4 sm:$0xff]   ;;  %v6145_v39 = vld [vmem:[#allocation7 + $0x2ac] ss:$16 sps:$4 sm:$0xff]  }
 0x230   :  { %v5208_v51 = vadd.f32 %v2194_v47, %v6498_v34  ;;  %v5240_v52 = vadd.f32 %v2646_v48, %v6502_v35  ;;  %v2196_v53 = vpop.f32.mrb[9].mxu0  ;;  %v2648_v54 = vpop.f32.mrb[9].mxu1  ;;  %3708 = vmatprep.subr.bf16.mxu0 %v6124_v24  ;;  %3934 = vmatprep.subr.bf16.mxu1 %v6127_v38  ;;  %v6137_v24 = vld [vmem:[#allocation7 + $0x288] ss:$16 sps:$4 sm:$0xff]   ;;  %v6142_v38 = vld [vmem:[#allocation7 + $0x2a4] ss:$16 sps:$4 sm:$0xff]  }
 0x231   :  { %v5209_v57 = vadd.f32 %v2196_v53, %v6506_v36  ;;  %v5241_v58 = vadd.f32 %v2648_v54, %v6510_v37  ;;  %v2198_v59 = vpop.f32.mrb[10].mxu0  ;;  %v2650_v60 = vpop.f32.mrb[10].mxu1  ;;  %3633 = vmatprep.mubr.bf16.mxu0 %v2774_v45  ;;  %3859 = vmatprep.mubr.bf16.mxu1 %v2774_v45  ;;  %v6143_v53 = vld [vmem:[#allocation7 + $0x2a8] ss:$16 sps:$4 sm:$0xff]   ;;  %v6148_v54 = vld [vmem:[#allocation7 + $0x2c4] ss:$16 sps:$4 sm:$0xff]  }
 0x232   :  { %v5210_v61 = vadd.f32 %v2198_v59, %v6498_v34  ;;  %v5242_v62 = vadd.f32 %v2650_v60, %v6502_v35  ;;  %v2200_v0 = vpop.f32.mrb[11].mxu0  ;;  %v2652_v2 = vpop.f32.mrb[11].mxu1  ;;  %3634 = vmatmul.mubr.bf16.gmra.mrb[36].mxu0 %v2773_v43  ;;  %3860 = vmatmul.mubr.bf16.gmra.mrb[36].mxu1 %v2773_v43  ;;  %v2721_v8 = vmax.f32 %v5208_v51, 0.0  ;;  %v2723_v9 = vmax.f32 %v5240_v52, 0.0  ;;  %v6140_v52 = vld [vmem:[#allocation7 + $0x2a0] ss:$16 sps:$4 sm:$0xff]  }
 0x233   :  { %v5211_v3 = vadd.f32 %v2200_v0, %v6506_v36  ;;  %v5243_v4 = vadd.f32 %v2652_v2, %v6510_v37  ;;  %3709 = vmatpush1.bf16.msra.mxu0 %v6122_v49  ;;  %3935 = vmatpush1.bf16.msra.mxu1 %v6125_v50  ;;  %v2722_v13 = vmax.f32 %v5209_v57, 0.0  ;;  %v2724_v14 = vmax.f32 %v5241_v58, 0.0  ;;  %v6151_v59 = vld [vmem:[#allocation7 + $0x2cc] ss:$16 sps:$4 sm:$0xff]  }
 0x234   :  { %v2725_v10 = vmax.f32 %v5210_v61, 0.0  ;;  %v2727_v11 = vmax.f32 %v5242_v62, 0.0  ;;  %3710 = vmatprep.subr.bf16.mxu0 %v6130_v55  ;;  %3936 = vmatprep.subr.bf16.mxu1 %v6133_v56 }
 0x235   :  { %v2726_v15 = vmax.f32 %v5211_v3, 0.0  ;;  %v2728_v16 = vmax.f32 %v5243_v4, 0.0 }
 0x236   :  { %v2777_v17 = vpack.c.bf16 %v2725_v10, %v2721_v8  ;;  %v6544_v19 = vpack.c.bf16 %v2727_v11, %v2723_v9  ;;  %v6146_v8 = vld [vmem:[#allocation7 + $0x2c0] ss:$16 sps:$4 sm:$0xff]   ;;  %v6149_v9 = vld [vmem:[#allocation7 + $0x2c8] ss:$16 sps:$4 sm:$0xff]  }
 0x237   :  { %v2778_v20 = vpack.c.bf16 %v2726_v15, %v2722_v13  ;;  %v6546_v21 = vpack.c.bf16 %v2728_v16, %v2724_v14  ;;  %v2204_v18 = vpop.f32.mrb[12].mxu0  ;;  %v2656_v22 = vpop.f32.mrb[12].mxu1  ;;  %3711 = vmatpush1.bf16.msra.mxu0 %v6128_v5  ;;  %3937 = vmatpush1.bf16.msra.mxu1 %v6131_v6  ;;  %v6154_v14 = vld [vmem:[#allocation7 + $0x2e4] ss:$16 sps:$4 sm:$0xff]   ;;  %v6157_v15 = vld [vmem:[#allocation7 + $0x2ec] ss:$16 sps:$4 sm:$0xff]  }
 0x238   :  { %v5212_v25 = vadd.f32 %v2204_v18, %v6498_v34  ;;  %v5244_v26 = vadd.f32 %v2656_v22, %v6502_v35  ;;  %v2206_v27 = vpop.f32.mrb[13].mxu0  ;;  %v2658_v31 = vpop.f32.mrb[13].mxu1  ;;  %3712 = vmatprep.subr.bf16.mxu0 %v6136_v7  ;;  %3938 = vmatprep.subr.bf16.mxu1 %v6139_v12 }
 0x239   :  { %v5213_v40 = vadd.f32 %v2206_v27, %v6506_v36  ;;  %v5245_v41 = vadd.f32 %v2658_v31, %v6510_v37  ;;  %v2208_v42 = vpop.f32.mrb[14].mxu0  ;;  %v2660_v43 = vpop.f32.mrb[14].mxu1  ;;  %3643 = vmatprep.mubr.bf16.mxu0 %v2778_v20  ;;  %3869 = vmatprep.mubr.bf16.mxu1 %v2778_v20  ;;  %v6152_v31 = vld [vmem:[#allocation7 + $0x2e0] ss:$16 sps:$4 sm:$0xff]  }
 0x23a   :  { %v5214_v45 = vadd.f32 %v2208_v42, %v6498_v34  ;;  %v5246_v47 = vadd.f32 %v2660_v43, %v6502_v35  ;;  %v2210_v48 = vpop.f32.mrb[15].mxu0  ;;  %v2662_v49 = vpop.f32.mrb[15].mxu1  ;;  %3644 = vmatmul.mubr.bf16.gmra.mrb[40].mxu0 %v2777_v17  ;;  %3870 = vmatmul.mubr.bf16.gmra.mrb[40].mxu1 %v2777_v17  ;;  %v2729_v55 = vmax.f32 %v5212_v25, 0.0  ;;  %v2731_v56 = vmax.f32 %v5244_v26, 0.0 }
 0x23b   :  { %v5215_v50 = vadd.f32 %v2210_v48, %v6506_v36  ;;  %v5247_v51 = vadd.f32 %v2662_v49, %v6510_v37  ;;  %3713 = vmatpush1.bf16.msra.mxu0 %v6134_v23  ;;  %3939 = vmatpush1.bf16.msra.mxu1 %v6137_v24  ;;  %v2730_v60 = vmax.f32 %v5213_v40, 0.0  ;;  %v2732_v61 = vmax.f32 %v5245_v41, 0.0 }
 0x23c   :  { %v2733_v57 = vmax.f32 %v5214_v45, 0.0  ;;  %v2735_v58 = vmax.f32 %v5246_v47, 0.0  ;;  %3714 = vmatprep.subr.bf16.mxu0 %v6142_v38  ;;  %3940 = vmatprep.subr.bf16.mxu1 %v6145_v39  ;;  %v6155_v38 = vld [vmem:[#allocation7 + $0x2e8] ss:$16 sps:$4 sm:$0xff]   ;;  %v6160_v39 = vld [vmem:[#allocation7 + $0x304] ss:$16 sps:$4 sm:$0xff]  }
 0x23d   :  { %v2734_v62 = vmax.f32 %v5215_v50, 0.0  ;;  %v2736_v0 = vmax.f32 %v5247_v51, 0.0  ;;  %v6163_v45 = vld [vmem:[#allocation7 + $0x30c] ss:$16 sps:$4 sm:$0xff]  }
 0x23e   :  { %v2781_v2 = vpack.c.bf16 %v2733_v57, %v2729_v55  ;;  %v6556_v3 = vpack.c.bf16 %v2735_v58, %v2731_v56  ;;  %v6158_v57 = vld [vmem:[#allocation7 + $0x300] ss:$16 sps:$4 sm:$0xff]   ;;  %v6161_v58 = vld [vmem:[#allocation7 + $0x308] ss:$16 sps:$4 sm:$0xff]  }
 0x23f   :  { %v2782_v4 = vpack.c.bf16 %v2734_v62, %v2730_v60  ;;  %v6558_v5 = vpack.c.bf16 %v2736_v0, %v2732_v61  ;;  %v2214_v6 = vpop.f32.mrb[16].mxu0  ;;  %v2666_v7 = vpop.f32.mrb[16].mxu1  ;;  %3715 = vmatpush1.bf16.msra.mxu0 %v6140_v52  ;;  %3941 = vmatpush1.bf16.msra.mxu1 %v6143_v53  ;;  %v6166_v0 = vld [vmem:[#allocation7 + $0x324] ss:$16 sps:$4 sm:$0xff]  }
 0x240   :  { %v5216_v10 = vadd.f32 %v2214_v6, %v6498_v34  ;;  %v5248_v11 = vadd.f32 %v2666_v7, %v6502_v35  ;;  %v2216_v12 = vpop.f32.mrb[17].mxu0  ;;  %v2668_v13 = vpop.f32.mrb[17].mxu1  ;;  %3716 = vmatprep.subr.bf16.mxu0 %v6148_v54  ;;  %3942 = vmatprep.subr.bf16.mxu1 %v6151_v59 }
 0x241   :  { %v5217_v16 = vadd.f32 %v2216_v12, %v6506_v36  ;;  %v5249_v17 = vadd.f32 %v2668_v13, %v6510_v37  ;;  %v2218_v20 = vpop.f32.mrb[18].mxu0  ;;  %v2670_v18 = vpop.f32.mrb[18].mxu1  ;;  %3653 = vmatprep.mubr.bf16.mxu0 %v2782_v4  ;;  %3879 = vmatprep.mubr.bf16.mxu1 %v2782_v4 }
 0x242   :  { %v5218_v22 = vadd.f32 %v2218_v20, %v6498_v34  ;;  %v5250_v23 = vadd.f32 %v2670_v18, %v6502_v35  ;;  %v2220_v24 = vpop.f32.mrb[19].mxu0  ;;  %v2672_v25 = vpop.f32.mrb[19].mxu1  ;;  %3654 = vmatmul.mubr.bf16.gmra.mrb[44].mxu0 %v2781_v2  ;;  %3880 = vmatmul.mubr.bf16.gmra.mrb[44].mxu1 %v2781_v2  ;;  %v2737_v40 = vmax.f32 %v5216_v10, 0.0  ;;  %v2739_v41 = vmax.f32 %v5248_v11, 0.0  ;;  %v6169_v2 = vld [vmem:[#allocation7 + $0x32c] ss:$16 sps:$4 sm:$0xff]  }
 0x243   :  { %v5219_v26 = vadd.f32 %v2220_v24, %v6506_v36  ;;  %v5251_v27 = vadd.f32 %v2672_v25, %v6510_v37  ;;  %3717 = vmatpush1.bf16.msra.mxu0 %v6146_v8  ;;  %3943 = vmatpush1.bf16.msra.mxu1 %v6149_v9  ;;  %v2738_v47 = vmax.f32 %v5217_v16, 0.0  ;;  %v2740_v48 = vmax.f32 %v5249_v17, 0.0  ;;  %v6167_v16 = vld [vmem:[#allocation7 + $0x328] ss:$16 sps:$4 sm:$0xff]   ;;  %v6172_v17 = vld [vmem:[#allocation7 + $0x344] ss:$16 sps:$4 sm:$0xff]  }
 0x244   :  { %v2741_v42 = vmax.f32 %v5218_v22, 0.0  ;;  %v2743_v43 = vmax.f32 %v5250_v23, 0.0  ;;  %3718 = vmatprep.subr.bf16.mxu0 %v6154_v14  ;;  %3944 = vmatprep.subr.bf16.mxu1 %v6157_v15  ;;  %v6164_v15 = vld [vmem:[#allocation7 + $0x320] ss:$16 sps:$4 sm:$0xff]   ;;  %v6175_v24 = vld [vmem:[#allocation7 + $0x34c] ss:$16 sps:$4 sm:$0xff]  }
 0x245   :  { %v2742_v49 = vmax.f32 %v5219_v26, 0.0  ;;  %v2744_v50 = vmax.f32 %v5251_v27, 0.0 }
 0x246   :  { %v2785_v51 = vpack.c.bf16 %v2741_v42, %v2737_v40  ;;  %v6568_v52 = vpack.c.bf16 %v2743_v43, %v2739_v41 }
 0x247   :  { %v2786_v53 = vpack.c.bf16 %v2742_v49, %v2738_v47  ;;  %v6570_v54 = vpack.c.bf16 %v2744_v50, %v2740_v48  ;;  %v2224_v55 = vpop.f32.mrb[20].mxu0  ;;  %v2676_v56 = vpop.f32.mrb[20].mxu1  ;;  %3719 = vmatpush1.bf16.msra.mxu0 %v6152_v31  ;;  %3945 = vmatpush1.bf16.msra.mxu1 %v6155_v38  ;;  %v6173_v47 = vld [vmem:[#allocation7 + $0x348] ss:$16 sps:$4 sm:$0xff]  }
 0x248   :  { %v5220_v59 = vadd.f32 %v2224_v55, %v6498_v34  ;;  %v5252_v60 = vadd.f32 %v2676_v56, %v6502_v35  ;;  %v2226_v61 = vpop.f32.mrb[21].mxu0  ;;  %v2678_v62 = vpop.f32.mrb[21].mxu1  ;;  %3720 = vmatprep.subr.bf16.mxu0 %v6160_v39  ;;  %3946 = vmatprep.subr.bf16.mxu1 %v6163_v45  ;;  %v6170_v45 = vld [vmem:[#allocation7 + $0x340] ss:$16 sps:$4 sm:$0xff]   ;;  %v6181_v55 = vld [vmem:[#allocation7 + $0x36c] ss:$16 sps:$4 sm:$0xff]  }
 0x249   :  { %v5221_v4 = vadd.f32 %v2226_v61, %v6506_v36  ;;  %v5253_v6 = vadd.f32 %v2678_v62, %v6510_v37  ;;  %v2228_v7 = vpop.f32.mrb[22].mxu0  ;;  %v2680_v8 = vpop.f32.mrb[22].mxu1  ;;  %3663 = vmatprep.mubr.bf16.mxu0 %v2786_v53  ;;  %3889 = vmatprep.mubr.bf16.mxu1 %v2786_v53  ;;  %v6178_v53 = vld [vmem:[#allocation7 + $0x364] ss:$16 sps:$4 sm:$0xff]  }
 0x24a   :  { %v5222_v9 = vadd.f32 %v2228_v7, %v6498_v34  ;;  %v5254_v10 = vadd.f32 %v2680_v8, %v6502_v35  ;;  %v2230_v11 = vpop.f32.mrb[23].mxu0  ;;  %v2682_v12 = vpop.f32.mrb[23].mxu1  ;;  %3664 = vmatmul.mubr.bf16.gmra.mrb[48].mxu0 %v2785_v51  ;;  %3890 = vmatmul.mubr.bf16.gmra.mrb[48].mxu1 %v2785_v51  ;;  %v2745_v20 = vmax.f32 %v5220_v59, 0.0  ;;  %v2747_v18 = vmax.f32 %v5252_v60, 0.0  ;;  %v6179_v7 = vld [vmem:[#allocation7 + $0x368] ss:$16 sps:$4 sm:$0xff]  }
 0x24b   :  { %v5223_v13 = vadd.f32 %v2230_v11, %v6506_v36  ;;  %v5255_v14 = vadd.f32 %v2682_v12, %v6510_v37  ;;  %3721 = vmatpush1.bf16.msra.mxu0 %v6158_v57  ;;  %3947 = vmatpush1.bf16.msra.mxu1 %v6161_v58  ;;  %v2746_v25 = vmax.f32 %v5221_v4, 0.0  ;;  %v2748_v26 = vmax.f32 %v5253_v6, 0.0  ;;  %v6176_v6 = vld [vmem:[#allocation7 + $0x360] ss:$16 sps:$4 sm:$0xff]   ;;  %v6184_v8 = vld [vmem:[#allocation7 + $0x384] ss:$16 sps:$4 sm:$0xff]  }
 0x24c   :  { %v2749_v22 = vmax.f32 %v5222_v9, 0.0  ;;  %v2751_v23 = vmax.f32 %v5254_v10, 0.0  ;;  %3722 = vmatprep.subr.bf16.mxu0 %v6166_v0  ;;  %3948 = vmatprep.subr.bf16.mxu1 %v6169_v2 }
 0x24d   :  { %v2750_v27 = vmax.f32 %v5223_v13, 0.0  ;;  %v2752_v31 = vmax.f32 %v5255_v14, 0.0  ;;  %v6187_v13 = vld [vmem:[#allocation7 + $0x38c] ss:$16 sps:$4 sm:$0xff]  }
 0x24e   :  { %v2789_v38 = vpack.c.bf16 %v2749_v22, %v2745_v20  ;;  %v6580_v39 = vpack.c.bf16 %v2751_v23, %v2747_v18 }
 0x24f   :  { %v2790_v40 = vpack.c.bf16 %v2750_v27, %v2746_v25  ;;  %v6582_v41 = vpack.c.bf16 %v2752_v31, %v2748_v26  ;;  %v2234_v42 = vpop.f32.mrb[24].mxu0  ;;  %v2686_v43 = vpop.f32.mrb[24].mxu1  ;;  %3723 = vmatpush1.bf16.msra.mxu0 %v6164_v15  ;;  %3949 = vmatpush1.bf16.msra.mxu1 %v6167_v16  ;;  %v6182_v26 = vld [vmem:[#allocation7 + $0x380] ss:$16 sps:$4 sm:$0xff]   ;;  %v6185_v27 = vld [vmem:[#allocation7 + $0x388] ss:$16 sps:$4 sm:$0xff]  }
 0x250   :  { %v5224_v48 = vadd.f32 %v2234_v42, %v6498_v34  ;;  %v5256_v49 = vadd.f32 %v2686_v43, %v6502_v35  ;;  %v2236_v50 = vpop.f32.mrb[25].mxu0  ;;  %v2688_v51 = vpop.f32.mrb[25].mxu1  ;;  %3724 = vmatprep.subr.bf16.mxu0 %v6172_v17  ;;  %3950 = vmatprep.subr.bf16.mxu1 %v6175_v24  ;;  %v6190_v43 = vld [vmem:[#allocation7 + $0x3a4] ss:$16 sps:$4 sm:$0xff]  }
 0x251   :  { %v5225_v56 = vadd.f32 %v2236_v50, %v6506_v36  ;;  %v5257_v57 = vadd.f32 %v2688_v51, %v6510_v37  ;;  %v2238_v58 = vpop.f32.mrb[26].mxu0  ;;  %v2690_v59 = vpop.f32.mrb[26].mxu1  ;;  %3673 = vmatprep.mubr.bf16.mxu0 %v2790_v40  ;;  %3899 = vmatprep.mubr.bf16.mxu1 %v2790_v40 }
 0x252   :  { %v5226_v60 = vadd.f32 %v2238_v58, %v6498_v34  ;;  %v5258_v61 = vadd.f32 %v2690_v59, %v6502_v35  ;;  %v2240_v62 = vpop.f32.mrb[27].mxu0  ;;  %v2692_v0 = vpop.f32.mrb[27].mxu1  ;;  %3674 = vmatmul.mubr.bf16.gmra.mrb[52].mxu0 %v2789_v38  ;;  %3900 = vmatmul.mubr.bf16.gmra.mrb[52].mxu1 %v2789_v38  ;;  %v2753_v9 = vmax.f32 %v5224_v48, 0.0  ;;  %v2755_v10 = vmax.f32 %v5256_v49, 0.0  ;;  %v6188_v59 = vld [vmem:[#allocation7 + $0x3a0] ss:$16 sps:$4 sm:$0xff]  }
 0x253   :  { %v5227_v2 = vadd.f32 %v2240_v62, %v6506_v36  ;;  %v5259_v4 = vadd.f32 %v2692_v0, %v6510_v37  ;;  %3725 = vmatpush1.bf16.msra.mxu0 %v6170_v45  ;;  %3951 = vmatpush1.bf16.msra.mxu1 %v6173_v47  ;;  %v2754_v14 = vmax.f32 %v5225_v56, 0.0  ;;  %v2756_v15 = vmax.f32 %v5257_v57, 0.0  ;;  %v6193_v45 = vld [vmem:[#allocation7 + $0x3ac] ss:$16 sps:$4 sm:$0xff]  }
 0x254   :  { %v2757_v11 = vmax.f32 %v5226_v60, 0.0  ;;  %v2759_v12 = vmax.f32 %v5258_v61, 0.0  ;;  %3726 = vmatprep.subr.bf16.mxu0 %v6178_v53  ;;  %3952 = vmatprep.subr.bf16.mxu1 %v6181_v55  ;;  %v6191_v60 = vld [vmem:[#allocation7 + $0x3a8] ss:$16 sps:$4 sm:$0xff]   ;;  %v6196_v61 = vld [vmem:[#allocation7 + $0x3c4] ss:$16 sps:$4 sm:$0xff]  }
 0x255   :  { %v2758_v16 = vmax.f32 %v5227_v2, 0.0  ;;  %v2760_v17 = vmax.f32 %v5259_v4, 0.0 }
 0x256   :  { %v2793_v20 = vpack.c.bf16 %v2757_v11, %v2753_v9  ;;  %v6592_v18 = vpack.c.bf16 %v2759_v12, %v2755_v10  ;;  %v6194_v11 = vld [vmem:[#allocation7 + $0x3c0] ss:$16 sps:$4 sm:$0xff]   ;;  %v6197_v12 = vld [vmem:[#allocation7 + $0x3c8] ss:$16 sps:$4 sm:$0xff]  }
 0x257   :  { %v2794_v22 = vpack.c.bf16 %v2758_v16, %v2754_v14  ;;  %v6594_v23 = vpack.c.bf16 %v2760_v17, %v2756_v15  ;;  %v2244_v24 = vpop.f32.mrb[28].mxu0  ;;  %v2696_v25 = vpop.f32.mrb[28].mxu1  ;;  %3727 = vmatpush1.bf16.msra.mxu0 %v6176_v6  ;;  %3953 = vmatpush1.bf16.msra.mxu1 %v6179_v7  ;;  %v6205_v14 = vld [vmem:[#allocation7 + $0x3ec] ss:$16 sps:$4 sm:$0xff]   ;;  %v6200_v15 = vld [vmem:[#allocation7 + $0x3e0] ss:$16 sps:$4 sm:$0xff]  }
 0x258   :  { %v5228_v31 = vadd.f32 %v2244_v24, %v6498_v34  ;;  %v5260_v38 = vadd.f32 %v2696_v25, %v6502_v35  ;;  %v2246_v40 = vpop.f32.mrb[29].mxu0  ;;  %v2698_v42 = vpop.f32.mrb[29].mxu1  ;;  %3728 = vmatprep.subr.bf16.mxu0 %v6184_v8  ;;  %3954 = vmatprep.subr.bf16.mxu1 %v6187_v13  ;;  %v6202_v13 = vld [vmem:[#allocation7 + $0x3e4] ss:$16 sps:$4 sm:$0xff]   ;;  %v6203_v16 = vld [vmem:[#allocation7 + $0x3e8] ss:$16 sps:$4 sm:$0xff]  }
 0x259   :  { %v5229_v47 = vadd.f32 %v2246_v40, %v6506_v36  ;;  %v5261_v48 = vadd.f32 %v2698_v42, %v6510_v37  ;;  %v2248_v49 = vpop.f32.mrb[30].mxu0  ;;  %v2700_v50 = vpop.f32.mrb[30].mxu1  ;;  %3683 = vmatprep.mubr.bf16.mxu0 %v2794_v22  ;;  %3909 = vmatprep.mubr.bf16.mxu1 %v2794_v22  ;;  %v6206_v17 = vld [vmem:[#allocation8 + $0x40] sm:$0xff]   ;;  %v6210_v25 = vld [vmem:[#allocation8 + $0x48] sm:$0xff]   ;;  %v6215_v40 = vld [vmem:[#allocation8 + $0x10] sm:$0xff]  }
 0x25a   :  { %v5230_v51 = vadd.f32 %v2248_v49, %v6498_v34  ;;  %v5262_v53 = vadd.f32 %v2700_v50, %v6502_v35  ;;  %v2250_v55 = vpop.f32.mrb[31].mxu0  ;;  %v2702_v56 = vpop.f32.mrb[31].mxu1  ;;  %3684 = vmatmul.mubr.bf16.gmra.mrb[56].mxu0 %v2793_v20  ;;  %3910 = vmatmul.mubr.bf16.gmra.mrb[56].mxu1 %v2793_v20  ;;  %v2761_v62 = vmax.f32 %v5228_v31, 0.0  ;;  %v2763_v0 = vmax.f32 %v5260_v38, 0.0  ;;  %v6199_v34 = vld [vmem:[#allocation7 + $0x3cc] ss:$16 sps:$4 sm:$0xff]  }
 0x25b   :  { %v5231_v57 = vadd.f32 %v2250_v55, %v6506_v36  ;;  %v5263_v58 = vadd.f32 %v2702_v56, %v6510_v37  ;;  %3729 = vmatpush1.bf16.msra.mxu0 %v6182_v26  ;;  %3955 = vmatpush1.bf16.msra.mxu1 %v6185_v27  ;;  %v2762_v35 = vmax.f32 %v5229_v47, 0.0  ;;  %v2764_v6 = vmax.f32 %v5261_v48, 0.0  ;;  %v6208_v20 = vld [vmem:[#allocation8 + $0xc0] sm:$0xff]   ;;  %v6212_v26 = vld [vmem:[#allocation8 + $0xc8] sm:$0xff]   ;;  %v6214_v31 = vld [vmem:[#allocation8 + $0x50] sm:$0xff]  }
 0x25c   :  { %v2765_v2 = vmax.f32 %v5230_v51, 0.0  ;;  %v2767_v4 = vmax.f32 %v5262_v53, 0.0  ;;  %3730 = vmatprep.subr.bf16.mxu0 %v6190_v43  ;;  %3956 = vmatprep.subr.bf16.mxu1 %v6193_v45  ;;  %v6207_v22 = vld [vmem:[#allocation8] sm:$0xff]   ;;  %v6213_v27 = vld [vmem:[#allocation8 + $0x88] sm:$0xff]   ;;  %v6216_v38 = vld [vmem:[#allocation8 + $0xd0] sm:$0xff]  }
 0x25d   :  { %v2766_v7 = vmax.f32 %v5231_v57, 0.0  ;;  %v2768_v8 = vmax.f32 %v5263_v58, 0.0  ;;  %v6209_v24 = vld [vmem:[#allocation8 + $0x80] sm:$0xff]   ;;  %v6217_v42 = vld [vmem:[#allocation8 + $0x90] sm:$0xff]   ;;  %v6218_v43 = vld [vmem:[#allocation8 + $0x58] sm:$0xff]  }
 0x25e   :  { %v2797_v9 = vpack.c.bf16 %v2765_v2, %v2761_v62  ;;  %v6604_v36 = vpack.c.bf16 %v2767_v4, %v2763_v0  ;;  %v6221_v45 = vld [vmem:[#allocation8 + $0x98] sm:$0xff]   ;;  %v6222_v47 = vld [vmem:[#allocation8 + $0x60] sm:$0xff]   ;;  %v6226_v51 = vld [vmem:[#allocation8 + $0x68] sm:$0xff]  }
 0x25f   :  { %v2798_v37 = vpack.c.bf16 %v2766_v7, %v2762_v35  ;;  %v6606_v10 = vpack.c.bf16 %v2768_v8, %v2764_v6  ;;  %3731 = vmatpush1.bf16.msra.mxu0 %v6188_v59  ;;  %3957 = vmatpush1.bf16.msra.mxu1 %v6191_v60  ;;  %v6224_v48 = vld [vmem:[#allocation8 + $0xe0] sm:$0xff]   ;;  %v6229_v53 = vld [vmem:[#allocation8 + $0xa8] sm:$0xff]   ;;  %v6230_v55 = vld [vmem:[#allocation8 + $0x70] sm:$0xff]  }
 0x260   :  { %3732 = vmatprep.subr.bf16.mxu0 %v6196_v61  ;;  %3958 = vmatprep.subr.bf16.mxu1 %v6199_v34  ;;  %v6223_v49 = vld [vmem:[#allocation8 + $0x20] sm:$0xff]   ;;  %v6232_v56 = vld [vmem:[#allocation8 + $0xf0] sm:$0xff]  }
 0x261   :  { %3693 = vmatprep.mubr.bf16.mxu0 %v2798_v37  ;;  %3919 = vmatprep.mubr.bf16.mxu1 %v2798_v37  ;;  %v6225_v50 = vld [vmem:[#allocation8 + $0xa0] sm:$0xff]   ;;  %v6231_v57 = vld [vmem:[#allocation8 + $0x30] sm:$0xff]  }
 0x262   :  { %3694 = vmatmul.mubr.bf16.gmra.mrb[60].mxu0 %v2797_v9  ;;  %3920 = vmatmul.mubr.bf16.gmra.mrb[60].mxu1 %v2797_v9  ;;  %v6233_v58 = vld [vmem:[#allocation8 + $0xb0] sm:$0xff]  }
 0x263   :  { %3733 = vmatpush1.bf16.msra.mxu0 %v6194_v11  ;;  %3736 = vmatprep.mubr.bf16.mxu0 %v6522_v1 }
 0x264   :  { %3959 = vmatpush1.bf16.msra.mxu1 %v6197_v12  ;;  %3962 = vmatprep.mubr.bf16.mxu1 %v6522_v1  ;;  %v6211_v1 = vld [vmem:[#allocation8 + $0x8] sm:$0xff]  }
 0x265   :  { %3734 = vmatprep.subr.bf16.mxu0 %v6202_v13  ;;  %3960 = vmatprep.subr.bf16.mxu1 %v6205_v14 }
 0x267   :  { %3735 = vmatpush1.bf16.msra.mxu0 %v6200_v15 }
 0x268   :  { %3961 = vmatpush1.bf16.msra.mxu1 %v6203_v16  ;;  %5072 = vmatprep.subr.bf16.mxu0 %v6206_v17 }
 0x269   :  { %5136 = vmatprep.subr.bf16.mxu1 %v6208_v20 }
 0x26a   :  { %3737 = vmatmul.mubr.bf16.vlgmr.msra.gmra.mrb[32].mxu0 %v6520_v63 }
 0x26b   :  { %3963 = vmatmul.mubr.bf16.vlgmr.msra.gmra.mrb[32].mxu1 %v6520_v63  ;;  %3746 = vmatprep.mubr.bf16.mxu0 %v6534_v46  ;;  %v6220_v63 = vld [vmem:[#allocation8 + $0xd8] sm:$0xff]  }
 0x26c   :  { %3972 = vmatprep.mubr.bf16.mxu1 %v6534_v46  ;;  %5073 = vmatpush3.bf16.msra.mxu0 %v6207_v22  ;;  %v6219_v46 = vld [vmem:[#allocation8 + $0x18] sm:$0xff]  }
 0x26d   :  { %5137 = vmatpush3.bf16.msra.mxu1 %v6209_v24  ;;  %5074 = vmatprep.subr.bf16.mxu0 %v6210_v25 }
 0x26e   :  { %5138 = vmatprep.subr.bf16.mxu1 %v6212_v26 }
 0x270   :  { %5075 = vmatpush3.bf16.msra.mxu0 %v6211_v1 }
 0x271   :  { %5139 = vmatpush3.bf16.msra.mxu1 %v6213_v27  ;;  %5076 = vmatprep.subr.bf16.mxu0 %v6214_v31 }
 0x272   :  { %3747 = vmatmul.mubr.bf16.gmra.mrb[36].mxu0 %v6532_v44  ;;  %5140 = vmatprep.subr.bf16.mxu1 %v6216_v38 }
 0x273   :  { %3973 = vmatmul.mubr.bf16.gmra.mrb[36].mxu1 %v6532_v44  ;;  %3756 = vmatprep.mubr.bf16.mxu0 %v6546_v21  ;;  %v6228_v44 = vld [vmem:[#allocation8 + $0xe8] sm:$0xff]  }
 0x274   :  { %3982 = vmatprep.mubr.bf16.mxu1 %v6546_v21  ;;  %5077 = vmatpush3.bf16.msra.mxu0 %v6215_v40  ;;  %v6227_v21 = vld [vmem:[#allocation8 + $0x28] sm:$0xff]  }
 0x275   :  { %5141 = vmatpush3.bf16.msra.mxu1 %v6217_v42  ;;  %5078 = vmatprep.subr.bf16.mxu0 %v6218_v43 }
 0x276   :  { %5142 = vmatprep.subr.bf16.mxu1 %v6220_v63 }
 0x278   :  { %5079 = vmatpush3.bf16.msra.mxu0 %v6219_v46 }
 0x279   :  { %5143 = vmatpush3.bf16.msra.mxu1 %v6221_v45  ;;  %5080 = vmatprep.subr.bf16.mxu0 %v6222_v47 }
 0x27a   :  { %3757 = vmatmul.mubr.bf16.gmra.mrb[40].mxu0 %v6544_v19  ;;  %5144 = vmatprep.subr.bf16.mxu1 %v6224_v48 }
 0x27b   :  { %3983 = vmatmul.mubr.bf16.gmra.mrb[40].mxu1 %v6544_v19  ;;  %3766 = vmatprep.mubr.bf16.mxu0 %v6558_v5  ;;  %v6234_v19 = vld [vmem:[#allocation8 + $0x78] sm:$0xff]  }
 0x27c   :  { %3992 = vmatprep.mubr.bf16.mxu1 %v6558_v5  ;;  %5081 = vmatpush3.bf16.msra.mxu0 %v6223_v49  ;;  %v6235_v5 = vld [vmem:[#allocation8 + $0x38] sm:$0xff]  }
 0x27d   :  { %5145 = vmatpush3.bf16.msra.mxu1 %v6225_v50  ;;  %5082 = vmatprep.subr.bf16.mxu0 %v6226_v51 }
 0x27e   :  { %5146 = vmatprep.subr.bf16.mxu1 %v6228_v44 }
 0x280   :  { %5083 = vmatpush3.bf16.msra.mxu0 %v6227_v21 }
 0x281   :  { %5147 = vmatpush3.bf16.msra.mxu1 %v6229_v53  ;;  %5084 = vmatprep.subr.bf16.mxu0 %v6230_v55 }
 0x282   :  { %3767 = vmatmul.mubr.bf16.gmra.mrb[44].mxu0 %v6556_v3  ;;  %5148 = vmatprep.subr.bf16.mxu1 %v6232_v56 }
 0x283   :  { %3993 = vmatmul.mubr.bf16.gmra.mrb[44].mxu1 %v6556_v3  ;;  %3776 = vmatprep.mubr.bf16.mxu0 %v6570_v54  ;;  %v6236_v3 = vld [vmem:[#allocation8 + $0xf8] sm:$0xff]  }
 0x284   :  { %4002 = vmatprep.mubr.bf16.mxu1 %v6570_v54  ;;  %5085 = vmatpush3.bf16.msra.mxu0 %v6231_v57  ;;  %v2929_v54 = vld [vmem:[%s6760_s4] sm:$0xf] }
 0x285   :  { %5149 = vmatpush3.bf16.msra.mxu1 %v6233_v58  ;;  %5086 = vmatprep.subr.bf16.mxu0 %v6234_v19 }
 0x286   :  { %5150 = vmatprep.subr.bf16.mxu1 %v6236_v3 }
 0x288   :  { %5087 = vmatpush3.bf16.msra.mxu0 %v6235_v5 }
 0x28a   :  { %3777 = vmatmul.mubr.bf16.gmra.mrb[48].mxu0 %v6568_v52 }
 0x28b   :  { %4003 = vmatmul.mubr.bf16.gmra.mrb[48].mxu1 %v6568_v52  ;;  %3786 = vmatprep.mubr.bf16.mxu0 %v6582_v41  ;;  %v6237_v52 = vld [vmem:[#allocation8 + $0xb8] sm:$0xff]  }
 0x28c   :  { %4012 = vmatprep.mubr.bf16.mxu1 %v6582_v41  ;;  %5151 = vmatpush3.bf16.msra.mxu1 %v6237_v52  ;;  %v6649_v41 = vrot.slane %v2929_v54, %v383_v30 }
 0x292   :  { %3787 = vmatmul.mubr.bf16.gmra.mrb[52].mxu0 %v6580_v39 }
 0x293   :  { %4013 = vmatmul.mubr.bf16.gmra.mrb[52].mxu1 %v6580_v39  ;;  %3796 = vmatprep.mubr.bf16.mxu0 %v6594_v23  ;;  %v6645_v39 = vrot.slane %v2929_v54, %v375_v29 }
 0x294   :  { %4022 = vmatprep.mubr.bf16.mxu1 %v6594_v23  ;;  %v6657_v23 = vrot.slane %v2929_v54, %v387_v33 }
 0x29a   :  { %3797 = vmatmul.mubr.bf16.gmra.mrb[56].mxu0 %v6592_v18 }
 0x29b   :  { %4023 = vmatmul.mubr.bf16.gmra.mrb[56].mxu1 %v6592_v18  ;;  %3806 = vmatprep.mubr.bf16.mxu0 %v6606_v10  ;;  %v6653_v18 = vrot.slane %v2929_v54, %v379_v32 }
 0x29c   :  { %4032 = vmatprep.mubr.bf16.mxu1 %v6606_v10 }
 0x2a2   :  { %3807 = vmatmul.mubr.bf16.gmra.mrb[60].mxu0 %v6604_v36 }
 0x2a3   :  { %4033 = vmatmul.mubr.bf16.gmra.mrb[60].mxu1 %v6604_v36 }
 0x33d   :  { %v3738_v59 = vpop.f32.mrb[32].mxu0 }
 0x33e   :  { %v5264_v60 = vadd.f32 %v3738_v59, %v6645_v39  ;;  %v3964_v61 = vpop.f32.mrb[32].mxu1  ;;  %v3740_v62 = vpop.f32.mrb[33].mxu0 }
 0x33f   :  { %v5296_v29 = vadd.f32 %v3964_v61, %v6649_v41  ;;  %v5265_v0 = vadd.f32 %v3740_v62, %v6653_v18  ;;  %v3966_v2 = vpop.f32.mrb[33].mxu1  ;;  %v3742_v30 = vpop.f32.mrb[34].mxu0 }
 0x340   :  { %v5297_v4 = vadd.f32 %v3966_v2, %v6657_v23  ;;  %v5266_v32 = vadd.f32 %v3742_v30, %v6645_v39  ;;  %v3968_v34 = vpop.f32.mrb[34].mxu1  ;;  %v3744_v35 = vpop.f32.mrb[35].mxu0  ;;  %v4043_v7 = vmax.f32 %v5264_v60, 0.0 }
 0x341   :  { %v5298_v28 = vadd.f32 %v3968_v34, %v6649_v41  ;;  %v5267_v33 = vadd.f32 %v3744_v35, %v6653_v18  ;;  %v3970_v6 = vpop.f32.mrb[35].mxu1  ;;  %v4045_v36 = vmax.f32 %v5296_v29, 0.0  ;;  %v4044_v37 = vmax.f32 %v5265_v0, 0.0 }
 0x342   :  { %v4047_v8 = vmax.f32 %v5266_v32, 0.0  ;;  %v5299_v9 = vadd.f32 %v3970_v6, %v6657_v23  ;;  %v4046_v12 = vmax.f32 %v5297_v4, 0.0 }
 0x343   :  { %v4049_v10 = vmax.f32 %v5298_v28, 0.0  ;;  %v4048_v11 = vmax.f32 %v5267_v33, 0.0 }
 0x344   :  { %v4107_v13 = vpack.c.bf16 %v4047_v8, %v4043_v7  ;;  %v4050_v14 = vmax.f32 %v5299_v9, 0.0 }
 0x345   :  { %v4109_v15 = vpack.c.bf16 %v4049_v10, %v4045_v36  ;;  %v4108_v16 = vpack.c.bf16 %v4048_v11, %v4044_v37  ;;  %v3748_v17 = vpop.f32.mrb[36].mxu0 }
 0x346   :  { %v4110_v20 = vpack.c.bf16 %v4050_v14, %v4046_v12  ;;  %v5268_v22 = vadd.f32 %v3748_v17, %v6645_v39  ;;  %v3974_v24 = vpop.f32.mrb[36].mxu1  ;;  %v3750_v25 = vpop.f32.mrb[37].mxu0 }
 0x347   :  { %v5300_v26 = vadd.f32 %v3974_v24, %v6649_v41  ;;  %v5269_v1 = vadd.f32 %v3750_v25, %v6653_v18  ;;  %v3976_v27 = vpop.f32.mrb[37].mxu1  ;;  %v3752_v31 = vpop.f32.mrb[38].mxu0  ;;  %4434 = vmatprep.mubr.bf16.mxu0 %v4108_v16 }
 0x348   :  { %v5301_v38 = vadd.f32 %v3976_v27, %v6657_v23  ;;  %v5270_v40 = vadd.f32 %v3752_v31, %v6645_v39  ;;  %v3978_v42 = vpop.f32.mrb[38].mxu1  ;;  %4531 = vmatprep.mubr.bf16.mxu1 %v4110_v20  ;;  %v3754_v43 = vpop.f32.mrb[39].mxu0  ;;  %4435 = vmatmul.mubr.bf16.vlgmr.msra.gmra.mrb[64].mxu0 %v4107_v13  ;;  %v4051_v47 = vmax.f32 %v5268_v22, 0.0 }
 0x349   :  { %v5302_v63 = vadd.f32 %v3978_v42, %v6649_v41  ;;  %v5271_v46 = vadd.f32 %v3754_v43, %v6653_v18  ;;  %v3980_v45 = vpop.f32.mrb[39].mxu1  ;;  %4532 = vmatmul.mubr.bf16.vlgmr.msra.gmra.mrb[64].mxu1 %v4109_v15  ;;  %v4053_v50 = vmax.f32 %v5300_v26, 0.0  ;;  %v4052_v51 = vmax.f32 %v5269_v1, 0.0 }
 0x34a   :  { %v4055_v48 = vmax.f32 %v5270_v40, 0.0  ;;  %v5303_v49 = vadd.f32 %v3980_v45, %v6657_v23  ;;  %v4054_v53 = vmax.f32 %v5301_v38, 0.0 }
 0x34b   :  { %v4057_v44 = vmax.f32 %v5302_v63, 0.0  ;;  %v4056_v21 = vmax.f32 %v5271_v46, 0.0 }
 0x34c   :  { %v4111_v55 = vpack.c.bf16 %v4055_v48, %v4051_v47  ;;  %v4058_v56 = vmax.f32 %v5303_v49, 0.0 }
 0x34d   :  { %v4113_v57 = vpack.c.bf16 %v4057_v44, %v4053_v50  ;;  %v4112_v58 = vpack.c.bf16 %v4056_v21, %v4052_v51  ;;  %v3758_v19 = vpop.f32.mrb[40].mxu0 }
 0x34e   :  { %v4114_v3 = vpack.c.bf16 %v4058_v56, %v4054_v53  ;;  %v5272_v5 = vadd.f32 %v3758_v19, %v6645_v39  ;;  %v3984_v52 = vpop.f32.mrb[40].mxu1  ;;  %v3760_v54 = vpop.f32.mrb[41].mxu0 }
 0x34f   :  { %v5304_v59 = vadd.f32 %v3984_v52, %v6649_v41  ;;  %v5273_v60 = vadd.f32 %v3760_v54, %v6653_v18  ;;  %v3986_v61 = vpop.f32.mrb[41].mxu1  ;;  %v3762_v62 = vpop.f32.mrb[42].mxu0  ;;  %4442 = vmatprep.mubr.bf16.mxu0 %v4112_v58 }
 0x350   :  { %v5305_v29 = vadd.f32 %v3986_v61, %v6657_v23  ;;  %v5274_v0 = vadd.f32 %v3762_v62, %v6645_v39  ;;  %v3988_v2 = vpop.f32.mrb[42].mxu1  ;;  %4539 = vmatprep.mubr.bf16.mxu1 %v4114_v3  ;;  %v3764_v30 = vpop.f32.mrb[43].mxu0  ;;  %4443 = vmatmul.mubr.bf16.gmra.mrb[68].mxu0 %v4111_v55  ;;  %v4059_v35 = vmax.f32 %v5272_v5, 0.0 }
 0x351   :  { %v5306_v4 = vadd.f32 %v3988_v2, %v6649_v41  ;;  %v5275_v32 = vadd.f32 %v3764_v30, %v6653_v18  ;;  %v3990_v34 = vpop.f32.mrb[43].mxu1  ;;  %4540 = vmatmul.mubr.bf16.gmra.mrb[68].mxu1 %v4113_v57  ;;  %v4061_v6 = vmax.f32 %v5304_v59, 0.0  ;;  %v4060_v7 = vmax.f32 %v5273_v60, 0.0 }
 0x352   :  { %v4063_v28 = vmax.f32 %v5274_v0, 0.0  ;;  %v5307_v33 = vadd.f32 %v3990_v34, %v6657_v23  ;;  %v4062_v36 = vmax.f32 %v5305_v29, 0.0 }
 0x353   :  { %v4065_v8 = vmax.f32 %v5306_v4, 0.0  ;;  %v4064_v9 = vmax.f32 %v5275_v32, 0.0 }
 0x354   :  { %v4115_v37 = vpack.c.bf16 %v4063_v28, %v4059_v35  ;;  %v4066_v10 = vmax.f32 %v5307_v33, 0.0 }
 0x355   :  { %v4117_v11 = vpack.c.bf16 %v4065_v8, %v4061_v6  ;;  %v4116_v12 = vpack.c.bf16 %v4064_v9, %v4060_v7  ;;  %v3768_v13 = vpop.f32.mrb[44].mxu0 }
 0x356   :  { %v4118_v14 = vpack.c.bf16 %v4066_v10, %v4062_v36  ;;  %v5276_v15 = vadd.f32 %v3768_v13, %v6645_v39  ;;  %v3994_v16 = vpop.f32.mrb[44].mxu1  ;;  %v3770_v17 = vpop.f32.mrb[45].mxu0 }
 0x357   :  { %v5308_v20 = vadd.f32 %v3994_v16, %v6649_v41  ;;  %v5277_v22 = vadd.f32 %v3770_v17, %v6653_v18  ;;  %v3996_v24 = vpop.f32.mrb[45].mxu1  ;;  %v3772_v25 = vpop.f32.mrb[46].mxu0  ;;  %4450 = vmatprep.mubr.bf16.mxu0 %v4116_v12 }
 0x358   :  { %v5309_v26 = vadd.f32 %v3996_v24, %v6657_v23  ;;  %v5278_v1 = vadd.f32 %v3772_v25, %v6645_v39  ;;  %v3998_v27 = vpop.f32.mrb[46].mxu1  ;;  %4547 = vmatprep.mubr.bf16.mxu1 %v4118_v14  ;;  %v3774_v31 = vpop.f32.mrb[47].mxu0  ;;  %4451 = vmatmul.mubr.bf16.gmra.mrb[72].mxu0 %v4115_v37  ;;  %v4067_v43 = vmax.f32 %v5276_v15, 0.0 }
 0x359   :  { %v5310_v38 = vadd.f32 %v3998_v27, %v6649_v41  ;;  %v5279_v40 = vadd.f32 %v3774_v31, %v6653_v18  ;;  %v4000_v42 = vpop.f32.mrb[47].mxu1  ;;  %4548 = vmatmul.mubr.bf16.gmra.mrb[72].mxu1 %v4117_v11  ;;  %v4069_v45 = vmax.f32 %v5308_v20, 0.0  ;;  %v4068_v47 = vmax.f32 %v5277_v22, 0.0 }
 0x35a   :  { %v4071_v63 = vmax.f32 %v5278_v1, 0.0  ;;  %v5311_v46 = vadd.f32 %v4000_v42, %v6657_v23  ;;  %v4070_v50 = vmax.f32 %v5309_v26, 0.0 }
 0x35b   :  { %v4073_v48 = vmax.f32 %v5310_v38, 0.0  ;;  %v4072_v49 = vmax.f32 %v5279_v40, 0.0 }
 0x35c   :  { %v4119_v51 = vpack.c.bf16 %v4071_v63, %v4067_v43  ;;  %v4074_v44 = vmax.f32 %v5311_v46, 0.0 }
 0x35d   :  { %v4121_v21 = vpack.c.bf16 %v4073_v48, %v4069_v45  ;;  %v4120_v53 = vpack.c.bf16 %v4072_v49, %v4068_v47  ;;  %v3778_v55 = vpop.f32.mrb[48].mxu0 }
 0x35e   :  { %v4122_v56 = vpack.c.bf16 %v4074_v44, %v4070_v50  ;;  %v5280_v57 = vadd.f32 %v3778_v55, %v6645_v39  ;;  %v4004_v58 = vpop.f32.mrb[48].mxu1  ;;  %v3780_v19 = vpop.f32.mrb[49].mxu0 }
 0x35f   :  { %v5312_v3 = vadd.f32 %v4004_v58, %v6649_v41  ;;  %v5281_v5 = vadd.f32 %v3780_v19, %v6653_v18  ;;  %v4006_v52 = vpop.f32.mrb[49].mxu1  ;;  %v3782_v54 = vpop.f32.mrb[50].mxu0  ;;  %4458 = vmatprep.mubr.bf16.mxu0 %v4120_v53 }
 0x360   :  { %v5313_v59 = vadd.f32 %v4006_v52, %v6657_v23  ;;  %v5282_v60 = vadd.f32 %v3782_v54, %v6645_v39  ;;  %v4008_v61 = vpop.f32.mrb[50].mxu1  ;;  %4555 = vmatprep.mubr.bf16.mxu1 %v4122_v56  ;;  %v3784_v62 = vpop.f32.mrb[51].mxu0  ;;  %4459 = vmatmul.mubr.bf16.gmra.mrb[76].mxu0 %v4119_v51  ;;  %v4075_v30 = vmax.f32 %v5280_v57, 0.0 }
 0x361   :  { %v5314_v29 = vadd.f32 %v4008_v61, %v6649_v41  ;;  %v5283_v0 = vadd.f32 %v3784_v62, %v6653_v18  ;;  %v4010_v2 = vpop.f32.mrb[51].mxu1  ;;  %4556 = vmatmul.mubr.bf16.gmra.mrb[76].mxu1 %v4121_v21  ;;  %v4077_v34 = vmax.f32 %v5312_v3, 0.0  ;;  %v4076_v35 = vmax.f32 %v5281_v5, 0.0 }
 0x362   :  { %v4079_v4 = vmax.f32 %v5282_v60, 0.0  ;;  %v5315_v32 = vadd.f32 %v4010_v2, %v6657_v23  ;;  %v4078_v6 = vmax.f32 %v5313_v59, 0.0 }
 0x363   :  { %v4081_v28 = vmax.f32 %v5314_v29, 0.0  ;;  %v4080_v33 = vmax.f32 %v5283_v0, 0.0 }
 0x364   :  { %v4123_v7 = vpack.c.bf16 %v4079_v4, %v4075_v30  ;;  %v4082_v8 = vmax.f32 %v5315_v32, 0.0 }
 0x365   :  { %v4125_v9 = vpack.c.bf16 %v4081_v28, %v4077_v34  ;;  %v4124_v36 = vpack.c.bf16 %v4080_v33, %v4076_v35  ;;  %v3788_v37 = vpop.f32.mrb[52].mxu0 }
 0x366   :  { %v4126_v10 = vpack.c.bf16 %v4082_v8, %v4078_v6  ;;  %v5284_v11 = vadd.f32 %v3788_v37, %v6645_v39  ;;  %v4014_v12 = vpop.f32.mrb[52].mxu1  ;;  %v3790_v13 = vpop.f32.mrb[53].mxu0 }
 0x367   :  { %v5316_v14 = vadd.f32 %v4014_v12, %v6649_v41  ;;  %v5285_v15 = vadd.f32 %v3790_v13, %v6653_v18  ;;  %v4016_v16 = vpop.f32.mrb[53].mxu1  ;;  %v3792_v17 = vpop.f32.mrb[54].mxu0  ;;  %4466 = vmatprep.mubr.bf16.mxu0 %v4124_v36 }
 0x368   :  { %v5317_v20 = vadd.f32 %v4016_v16, %v6657_v23  ;;  %v5286_v22 = vadd.f32 %v3792_v17, %v6645_v39  ;;  %v4018_v24 = vpop.f32.mrb[54].mxu1  ;;  %4563 = vmatprep.mubr.bf16.mxu1 %v4126_v10  ;;  %v3794_v25 = vpop.f32.mrb[55].mxu0  ;;  %4467 = vmatmul.mubr.bf16.gmra.mrb[80].mxu0 %v4123_v7  ;;  %v4083_v31 = vmax.f32 %v5284_v11, 0.0 }
 0x369   :  { %v5318_v26 = vadd.f32 %v4018_v24, %v6649_v41  ;;  %v5287_v1 = vadd.f32 %v3794_v25, %v6653_v18  ;;  %v4020_v27 = vpop.f32.mrb[55].mxu1  ;;  %4564 = vmatmul.mubr.bf16.gmra.mrb[80].mxu1 %v4125_v9  ;;  %v4085_v42 = vmax.f32 %v5316_v14, 0.0  ;;  %v4084_v43 = vmax.f32 %v5285_v15, 0.0 }
 0x36a   :  { %v4087_v38 = vmax.f32 %v5286_v22, 0.0  ;;  %v5319_v40 = vadd.f32 %v4020_v27, %v6657_v23  ;;  %v4086_v45 = vmax.f32 %v5317_v20, 0.0 }
 0x36b   :  { %v4089_v63 = vmax.f32 %v5318_v26, 0.0  ;;  %v4088_v46 = vmax.f32 %v5287_v1, 0.0 }
 0x36c   :  { %v4127_v47 = vpack.c.bf16 %v4087_v38, %v4083_v31  ;;  %v4090_v48 = vmax.f32 %v5319_v40, 0.0 }
 0x36d   :  { %v4129_v49 = vpack.c.bf16 %v4089_v63, %v4085_v42  ;;  %v4128_v50 = vpack.c.bf16 %v4088_v46, %v4084_v43  ;;  %v3798_v51 = vpop.f32.mrb[56].mxu0 }
 0x36e   :  { %v4130_v44 = vpack.c.bf16 %v4090_v48, %v4086_v45  ;;  %v5288_v21 = vadd.f32 %v3798_v51, %v6645_v39  ;;  %v4024_v53 = vpop.f32.mrb[56].mxu1  ;;  %v3800_v55 = vpop.f32.mrb[57].mxu0 }
 0x36f   :  { %v5320_v56 = vadd.f32 %v4024_v53, %v6649_v41  ;;  %v5289_v57 = vadd.f32 %v3800_v55, %v6653_v18  ;;  %v4026_v58 = vpop.f32.mrb[57].mxu1  ;;  %v3802_v19 = vpop.f32.mrb[58].mxu0  ;;  %4474 = vmatprep.mubr.bf16.mxu0 %v4128_v50 }
 0x370   :  { %v5321_v3 = vadd.f32 %v4026_v58, %v6657_v23  ;;  %v5290_v5 = vadd.f32 %v3802_v19, %v6645_v39  ;;  %v4028_v52 = vpop.f32.mrb[58].mxu1  ;;  %4571 = vmatprep.mubr.bf16.mxu1 %v4130_v44  ;;  %v3804_v54 = vpop.f32.mrb[59].mxu0  ;;  %4475 = vmatmul.mubr.bf16.gmra.mrb[84].mxu0 %v4127_v47  ;;  %v4091_v62 = vmax.f32 %v5288_v21, 0.0 }
 0x371   :  { %v5322_v59 = vadd.f32 %v4028_v52, %v6649_v41  ;;  %v5291_v60 = vadd.f32 %v3804_v54, %v6653_v18  ;;  %v4030_v61 = vpop.f32.mrb[59].mxu1  ;;  %4572 = vmatmul.mubr.bf16.gmra.mrb[84].mxu1 %v4129_v49  ;;  %v4093_v2 = vmax.f32 %v5320_v56, 0.0  ;;  %v4092_v30 = vmax.f32 %v5289_v57, 0.0 }
 0x372   :  { %v4095_v29 = vmax.f32 %v5290_v5, 0.0  ;;  %v5323_v0 = vadd.f32 %v4030_v61, %v6657_v23  ;;  %v4094_v34 = vmax.f32 %v5321_v3, 0.0 }
 0x373   :  { %v4097_v4 = vmax.f32 %v5322_v59, 0.0  ;;  %v4096_v32 = vmax.f32 %v5291_v60, 0.0 }
 0x374   :  { %v4131_v35 = vpack.c.bf16 %v4095_v29, %v4091_v62  ;;  %v4098_v28 = vmax.f32 %v5323_v0, 0.0 }
 0x375   :  { %v4133_v33 = vpack.c.bf16 %v4097_v4, %v4093_v2  ;;  %v4132_v6 = vpack.c.bf16 %v4096_v32, %v4092_v30  ;;  %v3808_v7 = vpop.f32.mrb[60].mxu0 }
 0x376   :  { %v4134_v8 = vpack.c.bf16 %v4098_v28, %v4094_v34  ;;  %v5292_v9 = vadd.f32 %v3808_v7, %v6645_v39  ;;  %v4034_v36 = vpop.f32.mrb[60].mxu1  ;;  %v3810_v37 = vpop.f32.mrb[61].mxu0 }
 0x377   :  { %v5324_v10 = vadd.f32 %v4034_v36, %v6649_v41  ;;  %v5293_v11 = vadd.f32 %v3810_v37, %v6653_v18  ;;  %v4036_v12 = vpop.f32.mrb[61].mxu1  ;;  %v3812_v13 = vpop.f32.mrb[62].mxu0  ;;  %4482 = vmatprep.mubr.bf16.mxu0 %v4132_v6 }
 0x378   :  { %v5325_v14 = vadd.f32 %v4036_v12, %v6657_v23  ;;  %v5294_v15 = vadd.f32 %v3812_v13, %v6645_v39  ;;  %v4038_v16 = vpop.f32.mrb[62].mxu1  ;;  %4579 = vmatprep.mubr.bf16.mxu1 %v4134_v8  ;;  %v3814_v17 = vpop.f32.mrb[63].mxu0  ;;  %4483 = vmatmul.mubr.bf16.gmra.mrb[88].mxu0 %v4131_v35  ;;  %v4099_v25 = vmax.f32 %v5292_v9, 0.0 }
 0x379   :  { %v5326_v20 = vadd.f32 %v4038_v16, %v6649_v41  ;;  %v5295_v22 = vadd.f32 %v3814_v17, %v6653_v18  ;;  %v4040_v24 = vpop.f32.mrb[63].mxu1  ;;  %4580 = vmatmul.mubr.bf16.gmra.mrb[88].mxu1 %v4133_v33  ;;  %v4101_v27 = vmax.f32 %v5324_v10, 0.0  ;;  %v4100_v31 = vmax.f32 %v5293_v11, 0.0 }
 0x37a   :  { %v4103_v26 = vmax.f32 %v5294_v15, 0.0  ;;  %v5327_v1 = vadd.f32 %v4040_v24, %v6657_v23  ;;  %v4102_v42 = vmax.f32 %v5325_v14, 0.0  ;;  %v6726_v23 = vld [vmem:[%s6762_s6] ss:$0 sm:$0xff]  ;;  %s6367_s6 = smov [#allocation10]  }
 0x37b   :  { %v4105_v38 = vmax.f32 %v5326_v20, 0.0  ;;  %v4104_v40 = vmax.f32 %v5295_v22, 0.0  ;;  %s4617_s8 = sshll.u32 %s6367_s6, 4  ;;  %s4618_s8 = int_to_ptr.vmem [resolvable:$true] %s4617_s8 }
 0x37c   :  { %v4135_v39 = vpack.c.bf16 %v4103_v26, %v4099_v25  ;;  %v4106_v43 = vmax.f32 %v5327_v1, 0.0  ;;  %s6326_s9 = scalar_lea.vmem %s4618_s8, 2048  ;;  %p6331_p5 = scmp.lt.s32.totalorder %s4618_s8, %s4618_s8 }
 0x37d   :  { %v4137_v63 = vpack.c.bf16 %v4105_v38, %v4101_v27  ;;  %v4136_v46 = vpack.c.bf16 %v4104_v40, %v4100_v31  ;;  %p6327_p4 = scmp.ne.s32.totalorder %s4618_s8, %s6326_s9  ;;  %p6332_p6 = scmp.lt.s32.totalorder %s6326_s9, %s6326_s9 }
 0x37e   :  { %v4138_v45 = vpack.c.bf16 %v4106_v43, %v4102_v42 }
 0x37f   :  { %4490 = vmatprep.mubr.bf16.mxu0 %v4136_v46  ;;  %p6333_p7 = por %p6332_p6, %p6331_p5 }
 0x380   :  { %4587 = vmatprep.mubr.bf16.mxu1 %v4138_v45  ;;  %4491 = vmatmul.mubr.bf16.gmra.mrb[92].mxu0 %v4135_v39 }
 0x381   :  { %4588 = vmatmul.mubr.bf16.gmra.mrb[92].mxu1 %v4137_v63  ;;  %p6334_p8 = pnand %p6333_p7, %p6327_p4 }
 0x41b   :  { %v5088_v41 = vpop.f32.mrb[64].mxu0 }
 0x41c   :  { %v5152_v18 = vpop.f32.mrb[64].mxu1  ;;  %v5089_v47 = vpop.f32.mrb[65].mxu0 }
 0x41d   :  { %v5090_v48 = vadd.f32 %v5089_v47, %v5088_v41  ;;  %v5153_v49 = vpop.f32.mrb[65].mxu1  ;;  %v5091_v50 = vpop.f32.mrb[66].mxu0 }
 0x41e   :  { %v5154_v51 = vadd.f32 %v5153_v49, %v5152_v18  ;;  %v5155_v44 = vpop.f32.mrb[66].mxu1  ;;  %v5092_v21 = vpop.f32.mrb[67].mxu0 }
 0x41f   :  { %v4437_v53 = vadd.f32 %v5090_v48, %v6726_v23  ;;  %v5093_v55 = vadd.f32 %v5092_v21, %v5091_v50  ;;  %v5156_v56 = vpop.f32.mrb[67].mxu1 }
 0x420   :  { %v5157_v57 = vadd.f32 %v5156_v56, %v5155_v44 }
 0x421   :  { %v4534_v58 = vadd.f32 %v5154_v51, %v4437_v53  ;;  %v4440_v19 = vadd.f32 %v5093_v55, %v6726_v23 }
 0x423   :  { %4596 = vst [vmem:[#allocation10] sm:$0xff] %v4534_v58  ;;  %v4537_v3 = vadd.f32 %v5157_v57, %v4440_v19  ;;  %v5094_v5 = vpop.f32.mrb[68].mxu0 }
 0x424   :  { %v5158_v52 = vpop.f32.mrb[68].mxu1  ;;  %v5095_v54 = vpop.f32.mrb[69].mxu0 }
 0x425   :  { %4597 = vst [vmem:[#allocation10 + $0x8] sm:$0xff] %v4537_v3  ;;  %v5096_v59 = vadd.f32 %v5095_v54, %v5094_v5  ;;  %v5159_v60 = vpop.f32.mrb[69].mxu1  ;;  %v5097_v61 = vpop.f32.mrb[70].mxu0 }
 0x426   :  { %v5160_v62 = vadd.f32 %v5159_v60, %v5158_v52  ;;  %v5161_v29 = vpop.f32.mrb[70].mxu1  ;;  %v5098_v0 = vpop.f32.mrb[71].mxu0 }
 0x427   :  { %v4445_v2 = vadd.f32 %v5096_v59, %v6726_v23  ;;  %v5099_v30 = vadd.f32 %v5098_v0, %v5097_v61  ;;  %v5162_v4 = vpop.f32.mrb[71].mxu1 }
 0x428   :  { %v5163_v32 = vadd.f32 %v5162_v4, %v5161_v29 }
 0x429   :  { %v4542_v34 = vadd.f32 %v5160_v62, %v4445_v2  ;;  %v4448_v35 = vadd.f32 %v5099_v30, %v6726_v23 }
 0x42b   :  { %4598 = vst [vmem:[#allocation10 + $0x10] sm:$0xff] %v4542_v34  ;;  %v4545_v28 = vadd.f32 %v5163_v32, %v4448_v35  ;;  %v5100_v33 = vpop.f32.mrb[72].mxu0 }
 0x42c   :  { %v5164_v6 = vpop.f32.mrb[72].mxu1  ;;  %v5101_v7 = vpop.f32.mrb[73].mxu0 }
 0x42d   :  { %4599 = vst [vmem:[#allocation10 + $0x18] sm:$0xff] %v4545_v28  ;;  %v5102_v8 = vadd.f32 %v5101_v7, %v5100_v33  ;;  %v5165_v9 = vpop.f32.mrb[73].mxu1  ;;  %v5103_v36 = vpop.f32.mrb[74].mxu0 }
 0x42e   :  { %v5166_v37 = vadd.f32 %v5165_v9, %v5164_v6  ;;  %v5167_v10 = vpop.f32.mrb[74].mxu1  ;;  %v5104_v11 = vpop.f32.mrb[75].mxu0 }
 0x42f   :  { %v4453_v12 = vadd.f32 %v5102_v8, %v6726_v23  ;;  %v5105_v13 = vadd.f32 %v5104_v11, %v5103_v36  ;;  %v5168_v14 = vpop.f32.mrb[75].mxu1 }
 0x430   :  { %v5169_v15 = vadd.f32 %v5168_v14, %v5167_v10 }
 0x431   :  { %v4550_v16 = vadd.f32 %v5166_v37, %v4453_v12  ;;  %v4456_v17 = vadd.f32 %v5105_v13, %v6726_v23 }
 0x433   :  { %4600 = vst [vmem:[#allocation10 + $0x20] sm:$0xff] %v4550_v16  ;;  %v4553_v20 = vadd.f32 %v5169_v15, %v4456_v17  ;;  %v5106_v22 = vpop.f32.mrb[76].mxu0 }
 0x434   :  { %v5170_v24 = vpop.f32.mrb[76].mxu1  ;;  %v5107_v25 = vpop.f32.mrb[77].mxu0 }
 0x435   :  { %4601 = vst [vmem:[#allocation10 + $0x28] sm:$0xff] %v4553_v20  ;;  %v5108_v26 = vadd.f32 %v5107_v25, %v5106_v22  ;;  %v5171_v1 = vpop.f32.mrb[77].mxu1  ;;  %v5109_v27 = vpop.f32.mrb[78].mxu0 }
 0x436   :  { %v5172_v31 = vadd.f32 %v5171_v1, %v5170_v24  ;;  %v5173_v38 = vpop.f32.mrb[78].mxu1  ;;  %v5110_v40 = vpop.f32.mrb[79].mxu0 }
 0x437   :  { %v4461_v42 = vadd.f32 %v5108_v26, %v6726_v23  ;;  %v5111_v39 = vadd.f32 %v5110_v40, %v5109_v27  ;;  %v5174_v43 = vpop.f32.mrb[79].mxu1 }
 0x438   :  { %v5175_v63 = vadd.f32 %v5174_v43, %v5173_v38 }
 0x439   :  { %v4558_v46 = vadd.f32 %v5172_v31, %v4461_v42  ;;  %v4464_v45 = vadd.f32 %v5111_v39, %v6726_v23 }
 0x43b   :  { %4602 = vst [vmem:[#allocation10 + $0x30] sm:$0xff] %v4558_v46  ;;  %v4561_v41 = vadd.f32 %v5175_v63, %v4464_v45  ;;  %v5112_v18 = vpop.f32.mrb[80].mxu0 }
 0x43c   :  { %v5176_v47 = vpop.f32.mrb[80].mxu1  ;;  %v5113_v48 = vpop.f32.mrb[81].mxu0 }
 0x43d   :  { %4603 = vst [vmem:[#allocation10 + $0x38] sm:$0xff] %v4561_v41  ;;  %v5114_v49 = vadd.f32 %v5113_v48, %v5112_v18  ;;  %v5177_v50 = vpop.f32.mrb[81].mxu1  ;;  %v5115_v51 = vpop.f32.mrb[82].mxu0 }
 0x43e   :  { %v5178_v44 = vadd.f32 %v5177_v50, %v5176_v47  ;;  %v5179_v21 = vpop.f32.mrb[82].mxu1  ;;  %v5116_v53 = vpop.f32.mrb[83].mxu0 }
 0x43f   :  { %v4469_v55 = vadd.f32 %v5114_v49, %v6726_v23  ;;  %v5117_v56 = vadd.f32 %v5116_v53, %v5115_v51  ;;  %v5180_v57 = vpop.f32.mrb[83].mxu1 }
 0x440   :  { %v5181_v58 = vadd.f32 %v5180_v57, %v5179_v21 }
 0x441   :  { %v4566_v19 = vadd.f32 %v5178_v44, %v4469_v55  ;;  %v4472_v3 = vadd.f32 %v5117_v56, %v6726_v23 }
 0x443   :  { %4604 = vst [vmem:[#allocation10 + $0x40] sm:$0xff] %v4566_v19  ;;  %v4569_v5 = vadd.f32 %v5181_v58, %v4472_v3  ;;  %v5118_v52 = vpop.f32.mrb[84].mxu0 }
 0x444   :  { %v5182_v54 = vpop.f32.mrb[84].mxu1  ;;  %v5119_v59 = vpop.f32.mrb[85].mxu0 }
 0x445   :  { %4605 = vst [vmem:[#allocation10 + $0x48] sm:$0xff] %v4569_v5  ;;  %v5120_v60 = vadd.f32 %v5119_v59, %v5118_v52  ;;  %v5183_v61 = vpop.f32.mrb[85].mxu1  ;;  %v5121_v62 = vpop.f32.mrb[86].mxu0 }
 0x446   :  { %v5184_v29 = vadd.f32 %v5183_v61, %v5182_v54  ;;  %v5185_v0 = vpop.f32.mrb[86].mxu1  ;;  %v5122_v2 = vpop.f32.mrb[87].mxu0 }
 0x447   :  { %v4477_v30 = vadd.f32 %v5120_v60, %v6726_v23  ;;  %v5123_v4 = vadd.f32 %v5122_v2, %v5121_v62  ;;  %v5186_v32 = vpop.f32.mrb[87].mxu1 }
 0x448   :  { %v5187_v34 = vadd.f32 %v5186_v32, %v5185_v0 }
 0x449   :  { %v4574_v35 = vadd.f32 %v5184_v29, %v4477_v30  ;;  %v4480_v28 = vadd.f32 %v5123_v4, %v6726_v23 }
 0x44b   :  { %4606 = vst [vmem:[#allocation10 + $0x50] sm:$0xff] %v4574_v35  ;;  %v4577_v33 = vadd.f32 %v5187_v34, %v4480_v28  ;;  %v5124_v6 = vpop.f32.mrb[88].mxu0 }
 0x44c   :  { %v5188_v7 = vpop.f32.mrb[88].mxu1  ;;  %v5125_v8 = vpop.f32.mrb[89].mxu0 }
 0x44d   :  { %4607 = vst [vmem:[#allocation10 + $0x58] sm:$0xff] %v4577_v33  ;;  %v5126_v9 = vadd.f32 %v5125_v8, %v5124_v6  ;;  %v5189_v36 = vpop.f32.mrb[89].mxu1  ;;  %v5127_v37 = vpop.f32.mrb[90].mxu0 }
 0x44e   :  { %v5190_v10 = vadd.f32 %v5189_v36, %v5188_v7  ;;  %v5191_v11 = vpop.f32.mrb[90].mxu1  ;;  %v5128_v12 = vpop.f32.mrb[91].mxu0 }
 0x44f   :  { %v4485_v13 = vadd.f32 %v5126_v9, %v6726_v23  ;;  %v5129_v14 = vadd.f32 %v5128_v12, %v5127_v37  ;;  %v5192_v15 = vpop.f32.mrb[91].mxu1 }
 0x450   :  { %v5193_v16 = vadd.f32 %v5192_v15, %v5191_v11 }
 0x451   :  { %v4582_v17 = vadd.f32 %v5190_v10, %v4485_v13  ;;  %v4488_v20 = vadd.f32 %v5129_v14, %v6726_v23 }
 0x453   :  { %4608 = vst [vmem:[#allocation10 + $0x60] sm:$0xff] %v4582_v17  ;;  %v4585_v22 = vadd.f32 %v5193_v16, %v4488_v20  ;;  %v5130_v24 = vpop.f32.mrb[92].mxu0 }
 0x454   :  { %v5194_v25 = vpop.f32.mrb[92].mxu1  ;;  %v5131_v26 = vpop.f32.mrb[93].mxu0 }
 0x455   :  { %4609 = vst [vmem:[#allocation10 + $0x68] sm:$0xff] %v4585_v22  ;;  %v5132_v1 = vadd.f32 %v5131_v26, %v5130_v24  ;;  %v5195_v27 = vpop.f32.mrb[93].mxu1  ;;  %v5133_v31 = vpop.f32.mrb[94].mxu0 }
 0x456   :  { %v5196_v38 = vadd.f32 %v5195_v27, %v5194_v25  ;;  %v5197_v40 = vpop.f32.mrb[94].mxu1  ;;  %v5134_v42 = vpop.f32.mrb[95].mxu0 }
 0x457   :  { %v4493_v39 = vadd.f32 %v5132_v1, %v6726_v23  ;;  %v5135_v43 = vadd.f32 %v5134_v42, %v5133_v31  ;;  %v5198_v63 = vpop.f32.mrb[95].mxu1 }
 0x458   :  { %v5199_v46 = vadd.f32 %v5198_v63, %v5197_v40 }
 0x459   :  { %v4590_v45 = vadd.f32 %v5196_v38, %v4493_v39  ;;  %v4496_v41 = vadd.f32 %v5135_v43, %v6726_v23 }
 0x45b   :  { %4610 = vst [vmem:[#allocation10 + $0x70] sm:$0xff] %v4590_v45  ;;  %v4593_v18 = vadd.f32 %v5199_v46, %v4496_v41 }
 0x45d   :  { %4611 = vst [vmem:[#allocation10 + $0x78] sm:$0xff] %v4593_v18 }
 0x45e   :  { %6337 = shalt.err (!%p6334_p8)
}
 0x45f   :  { %s6338_s14 = scalar_lea.hbm %s6763_s7, 2048 }
 0x460   :  { %p6339_p9 = scmp.ne.s32.totalorder %s6763_s7, %s6338_s14  ;;  %p6342_p10 = scmp.lt.u32.totalorder %s6338_s14, %s6763_s7 }
 0x462   :  { %p6344_p11 = pnand %p6342_p10, %p6339_p9 }
 0x464   :  { %6347 = shalt.err (!%p6344_p11)
}
 0x465   :  { %s6368_s16 = smov 128   ;;  %s6369_s19 = smov 8  }
 0x466   :  { %4623 = dma.vmem_to_hbm [thread:$0]  %s4618_s8, 2048, %s6763_s7, [#allocation4], %s6368_s16, %s6368_s16, %s6369_s19  }
 0x467   :  { %6354 = dma.done.wait [#allocation4], 2048  }
 0x468   :  { %6355 = vsyncadd [#allocation4], 4294965248 }
 0x469   :  { %4627 = vsyncpa [#allocation3], 1 }
 0x46a   :  { %4628 = vsyncpa [#allocation6], 1 }
 0x46b   :  { %4629 = vsyncpa [#allocation9], 1 }
 0x46c   :  { %4630 = vsyncpa [#allocation4], 1 }

</bundles_post_ra>
